<compile_context>
chip_gen: v7x
topology: tpu7x:2x2x1
jax: 0.10.0
libtpu: 0.0.40
codegen_flags: <defaults>
</compile_context>

<pallas_src>
import math
import jax
import jax.numpy as jnp
from jax import lax
from jax.experimental import pallas as pl
from jax.experimental.pallas import tpu as pltpu

MAX_SPEAKERS = 8  # fixed-size per-speaker hidden-state table (speaker ids must be < this)


def _lstm_cell(gates, c_prev, hs):
    """One LSTM cell update given pre-activation gates (B, 4*hs), PyTorch i|f|g|o order."""
    i_g = jax.nn.sigmoid(gates[:, 0:hs])
    f_g = jax.nn.sigmoid(gates[:, hs:2 * hs])
    g_g = jnp.tanh(gates[:, 2 * hs:3 * hs])
    o_g = jax.nn.sigmoid(gates[:, 3 * hs:4 * hs])
    c_new = f_g * c_prev + i_g * g_g
    h_new = o_g * jnp.tanh(c_new)
    return h_new, c_new


# --------------------------------------------------------------------------
# Fused kernel: RNN_D + (attention + RNN_S + RNN_G) loop.
# One grid step handles a block of B_blk dialogues; all matmuls have M=B_blk.
# Layout is (T, B_blk, feature) so per-utterance rows are first-axis indexing.
# --------------------------------------------------------------------------
def interact_fused_kernel(
        spk_ref,                      # (T, B, 1)  int32 speaker ids
        emb_ref,                      # (T, B, E)  bf16 embedded utterances
        w4_ref,                       # (4H, 4H)   bf16 packed [d_wih; d_whh; g_wih_top]
        ws_ref,                       # (4H, 8H)   bf16 packed [s_wih; s_whh]
        wqkv_ref,                     # (3H, H)    bf16 packed [wq; wk; wk@wv]
        bias_ref,                     # (8, 8H)    f32 packed biases / folded constants
        op_ref,                       # (T, B, H)  f32 output
        spop_ref,                     # (T, B, 2H) f32 output
        dlg_ref,                      # scratch (T, B, H)  RNN_D outputs
        kp_ref,                       # scratch (T, B, H)  attention key cache
        v_ref,                        # scratch (T, B, H)  attention value cache
        spk_tbl_ref):                 # scratch (S, B, 2H) per-speaker hidden table
    T, B, E = emb_ref.shape
    H = op_ref.shape[2]
    H2 = 2 * H
    f32 = jnp.float32
    bf16 = jnp.bfloat16
    inv_sqrt = 1.0 / math.sqrt(H)

    # ---- packed bf16 weights, split with tile-aligned static row slices ----
    w4 = w4_ref[...]
    d_wih, d_whh = w4[0:H], w4[H:2 * H]
    g_wih_top, g_wih_cur = w4[2 * H:4 * H], w4[3 * H:4 * H]
    ws = ws_ref[...]
    s_wih_att, s_wih_cur, s_whh = ws[0:H], ws[H:2 * H], ws[2 * H:4 * H]
    wqkv = wqkv_ref[...]
    wq, wk, wkv = wqkv[0:H], wqkv[H:2 * H], wqkv[2 * H:3 * H]

    # ---- biases / folded constants (f32), broadcast once to the batch rows ----
    d_b   = jnp.broadcast_to(bias_ref[0:1, 0:4 * H], (B, 4 * H))
    s_b   = jnp.broadcast_to(bias_ref[1:2, 0:8 * H], (B, 8 * H))
    g_c   = jnp.broadcast_to(bias_ref[2:3, 0:4 * H], (B, 4 * H))   # att_h@gW[:H] + d_h@g_whh + g_b
    bq    = jnp.broadcast_to(bias_ref[3:4, 0:H], (B, H))
    bk    = jnp.broadcast_to(bias_ref[4:5, 0:H], (B, H))
    bkv   = jnp.broadcast_to(bias_ref[5:6, 0:H], (B, H))
    h0    = bias_ref[6:7, 0:H2]                                    # (1, 2H)
    att_h = jnp.broadcast_to(bias_ref[7:8, 0:H], (B, H))

    row_iota = lax.broadcasted_iota(jnp.int32, (T, B, 1), 0)
    spk_iota = lax.broadcasted_iota(jnp.int32, (MAX_SPEAKERS, B, 1), 0)

    # ---------------- RNN_D: batched LSTM over the dialogue ----------------
    def rnnd_body(t, carry):
        h_d, c_d = carry
        gates = (jnp.dot(emb_ref[t], d_wih, preferred_element_type=f32) + d_b
                 + jnp.dot(h_d.astype(bf16), d_whh, preferred_element_type=f32))
        h_new, c_new = _lstm_cell(gates, c_d, H)
        dlg_ref[t] = h_new                         # row store, no masked selects
        return h_new, c_new

    zeros_bh = jnp.zeros((B, H), f32)
    lax.fori_loop(0, T, rnnd_body, (zeros_bh, zeros_bh))

    # ---------------- initialise caches / per-speaker state ----------------
    # op rows start as zeros, so their key/value projections are just the biases.
    kp_ref[...] = jnp.broadcast_to(bk, (T, B, H))
    v_ref[...] = jnp.broadcast_to(bkv, (T, B, H))
    # Every speaker starts from h_0 (table reset per dialogue like the reference dict).
    spk_tbl_ref[...] = jnp.broadcast_to(h0, (MAX_SPEAKERS, B, H2))

    # ---------------- interact loop over utterances ----------------
    def interact_body(diag, cell_prev):
        dlg_row = dlg_ref[diag]                                    # (B, H) f32
        dlg_bf = dlg_row.astype(bf16)

        # Projections that depend only on the dialogue (off the recurrence chain).
        q = jnp.dot(dlg_bf, wq, preferred_element_type=f32) + bq                    # (B, H)
        cur_proj = jnp.dot(dlg_bf, s_wih_cur, preferred_element_type=f32) + s_b     # (B, 8H)
        gbase = jnp.dot(dlg_bf, g_wih_cur, preferred_element_type=f32) + g_c        # (B, 4H)

        # Attention over previously written op rows (row `diag` is still the bias key).
        kp = kp_ref[...]                                           # (T, B, H)
        vv = v_ref[...]
        scores = jnp.sum(kp * q[None], axis=-1, keepdims=True) * inv_sqrt   # (T, B, 1)
        scores = jnp.where(row_iota <= diag, scores, -1e9)
        m = jnp.max(scores, axis=0, keepdims=True)
        e = jnp.exp(scores - m)
        p_att = e * pl.reciprocal(jnp.sum(e, axis=0, keepdims=True), approx=True)
        att_comp = jnp.sum(p_att * vv, axis=0)                     # (B, H)
        att = jnp.where(diag == 0, att_h, att_comp)                # diag==0 uses attention_h

        # Per-speaker hidden-state lookup (vectorised over batch rows).
        s_id = spk_ref[diag]                                       # (B, 1) int32
        spk_mask = spk_iota == s_id[None]                          # (S, B, 1)
        tbl = spk_tbl_ref[...]                                     # (S, B, 2H)
        h_spk = jnp.sum(jnp.where(spk_mask, tbl, 0.0), axis=0)     # (B, 2H)

        # RNN_S step: x_s = [att, cur]; the `cur` half + bias is cur_proj.
        gates_s = (jnp.dot(att.astype(bf16), s_wih_att, preferred_element_type=f32)
                   + jnp.dot(h_spk.astype(bf16), s_whh, preferred_element_type=f32)
                   + cur_proj)
        h_s, c_s = _lstm_cell(gates_s, cell_prev, H2)
        spk_tbl_ref[...] = jnp.where(spk_mask, h_s[None], tbl)
        spop_ref[diag] = h_s + jnp.concatenate([att_h, dlg_row], axis=-1)   # (B, 2H)

        # RNN_G step: x_g = [spop_row, fop_row]; fop_row is always zero in the
        # reference, so those weight rows were dropped; att_h/d_h halves are in g_c.
        gates_g = jnp.dot(h_s.astype(bf16), g_wih_top, preferred_element_type=f32) + gbase
        inv_cnt = 1.0 / (1.0 + diag.astype(f32))          # avg_cell = cell / (diag + 1)
        # TODO(synk): reference feeds the 2H-wide RNN_S cell into the H-wide RNN_G
        # cell state (shape bug in the PyTorch code); first H components kept, as in
        # the previously accepted version.
        h_g, _ = _lstm_cell(gates_g, c_s[:, 0:H] * inv_cnt, H)
        op_ref[diag] = h_g

        # Refresh the attention key/value caches with the freshly written op row.
        h_g_bf = h_g.astype(bf16)
        kp_ref[diag] = jnp.dot(h_g_bf, wk, preferred_element_type=f32) + bk
        v_ref[diag] = jnp.dot(h_g_bf, wkv, preferred_element_type=f32) + bkv
        return c_s

    lax.fori_loop(0, T, interact_body, jnp.zeros((B, H2), jnp.float32))


# --------------------------------------------------------------------------
# Wrapper: trace-time weight folds / packing + pallas_call
# --------------------------------------------------------------------------
def _round_up(x, m):
    return ((x + m - 1) // m) * m


def run_interact_fused(spk, emb, p, block_b=None):
    """spk: (B, T) int32 speaker ids; emb: (B, T, E) f32 embedded utterances."""
    B, T, E = emb.shape
    H = E
    H2, H4, H8 = 2 * H, 4 * H, 8 * H
    f32, bf16 = jnp.float32, jnp.bfloat16

    # Batch blocking: pad to a multiple of 8 so per-step (B, .) tiles fill sublanes.
    if block_b is None:
        block_b = min(128, _round_up(B, 8))
    Bp = _round_up(B, block_b)
    if Bp != B:
        emb = jnp.pad(emb, ((0, Bp - B), (0, 0), (0, 0)))
        spk = jnp.pad(spk, ((0, Bp - B), (0, 0)))
    nb = Bp // block_b

    # (T, B, .) layout: batch on the sublane axis, dynamic first-axis row indexing.
    emb_t = jnp.transpose(emb, (1, 0, 2)).astype(bf16)
    spk_t = jnp.transpose(spk.astype(jnp.int32), (1, 0))[:, :, None]

    # ---- trace-time algebraic folds ----
    wkv = jnp.dot(p["wk"], p["wv"])                       # values(keys(x)) = x@wkv + bkv
    bkv = jnp.dot(p["bk"], p["wv"]) + p["bv"]
    g_wih_top = p["g_wih"][:H2, :]                        # fop half of RNN_G input always zero
    g_const = (jnp.dot(p["att_h"], g_wih_top[:H, :])      # att_h half of spop_base is constant
               + jnp.dot(p["d_h"], p["g_whh"]) + p["g_b"])  # RNN_G h0 = d_h is constant

    # ---- operand packing: 3 bf16 weight slabs + 1 f32 bias slab ----
    w4 = jnp.concatenate([p["d_wih"], p["d_whh"], g_wih_top], axis=0).astype(bf16)   # (4H, 4H)
    ws = jnp.concatenate([p["s_wih"], p["s_whh"]], axis=0).astype(bf16)              # (4H, 8H)
    wqkv = jnp.concatenate([p["wq"], p["wk"], wkv], axis=0).astype(bf16)             # (3H, H)

    pad_row = lambda r: jnp.pad(r, ((0, 0), (0, H8 - r.shape[1])))
    bias = jnp.concatenate(
        [pad_row(p["d_b"]), pad_row(p["s_b"]), pad_row(g_const), pad_row(p["bq"]),
         pad_row(p["bk"]), pad_row(bkv), pad_row(p["h0"]), pad_row(p["att_h"])],
        axis=0).astype(f32)                                                          # (8, 8H)

    const_spec = lambda shape: pl.BlockSpec(shape, lambda i: (0, 0))
    batched_spec = lambda last: pl.BlockSpec((T, block_b, last), lambda i: (0, i, 0))

    op_t, spop_t = pl.pallas_call(
        interact_fused_kernel,
        grid=(nb,),
        in_specs=[
            batched_spec(1),            # speaker ids
            batched_spec(E),            # embedded utterances
            const_spec((H4, H4)),       # packed [d_wih; d_whh; g_wih_top]
            const_spec((H4, H8)),       # packed [s_wih; s_whh]
            const_spec((3 * H, H)),     # packed [wq; wk; wk@wv]
            const_spec((8, H8)),        # packed biases / constants
        ],
        out_specs=[batched_spec(H), batched_spec(H2)],
        out_shape=(jax.ShapeDtypeStruct((T, Bp, H), f32),
                   jax.ShapeDtypeStruct((T, Bp, H2), f32)),
        scratch_shapes=[
            pltpu.VMEM((T, block_b, H), f32),               # dialogue (RNN_D outputs)
            pltpu.VMEM((T, block_b, H), f32),               # attention key cache
            pltpu.VMEM((T, block_b, H), f32),               # attention value cache
            pltpu.VMEM((MAX_SPEAKERS, block_b, H2), f32),   # per-speaker hidden table
        ],
        compiler_params=pltpu.CompilerParams(
            dimension_semantics=("parallel",),              # batch blocks independent
            vmem_limit_bytes=32 * 1024 * 1024),
    )(spk_t, emb_t, w4, ws, wqkv, bias)

    op = jnp.transpose(op_t, (1, 0, 2))[:B]
    spop = jnp.transpose(spop_t, (1, 0, 2))[:B]
    return op, spop


# --------------------------------------------------------------------------
# Parameter init (deterministic, synthetic) + full forward wrapper
# --------------------------------------------------------------------------
def init_params(key, E, vocab):
    H = E
    ks = jax.random.split(key, 20)
    s = 0.1
    n = lambda k, shape: jax.random.normal(k, shape, jnp.float32) * s
    return {
        "emb": jax.random.normal(ks[0], (vocab, E), jnp.float32),
        # RNN_D: LSTM(E -> H); weights stored transposed as (in, 4H)
        "d_wih": n(ks[1], (E, 4 * H)), "d_whh": n(ks[2], (H, 4 * H)), "d_b": n(ks[3], (1, 4 * H)),
        # Attention linears (stored (in, out))
        "wq": n(ks[4], (E, E)), "bq": n(ks[5], (1, E)),
        "wk": n(ks[6], (E, E)), "bk": n(ks[7], (1, E)),
        "wv": n(ks[8], (E, E)), "bv": n(ks[9], (1, E)),
        # RNN_S: LSTM(2E -> 2E)
        "s_wih": n(ks[10], (2 * E, 8 * E)), "s_whh": n(ks[11], (2 * E, 8 * E)),
        "s_b": n(ks[12], (1, 8 * E)),
        # RNN_G: LSTM(3E -> H)
        "g_wih": n(ks[13], (3 * E, 4 * H)), "g_whh": n(ks[14], (H, 4 * H)), "g_b": n(ks[15], (1, 4 * H)),
        # per-call torch.randn states, made deterministic
        "h0": jax.random.normal(ks[16], (1, 2 * H), jnp.float32),
        "d_h": jax.random.normal(ks[17], (1, H), jnp.float32),
        "att_h": jax.random.normal(ks[18], (1, H), jnp.float32),
    }


def interact_forward(chat_ids, speaker_info, sp_dialogue, sp_ind, inputs, p):
    del sp_dialogue, sp_ind  # unused by the reference forward
    emb = p["emb"][inputs]                               # (B, T, E) embedding lookup (JAX glue)
    spk = speaker_info[chat_ids].astype(jnp.int32)       # (B, T) speaker id per utterance (glue)
    return run_interact_fused(spk, emb, p)


if __name__ == "__main__":
    B, T, E, VOCAB, N_DIALOGUES, N_SPK = 2, 8, 32, 16, 2, 3
    key = jax.random.PRNGKey(0)
    kparam, kin, kspk = jax.random.split(key, 3)

    params = init_params(kparam, E, VOCAB)
    inputs = jax.random.randint(kin, (B, T), 0, VOCAB, dtype=jnp.int32)
    chat_ids = jnp.arange(B, dtype=jnp.int32)
    speaker_info = jax.random.randint(kspk, (N_DIALOGUES, T), 0, N_SPK, dtype=jnp.int32)
    sp_dialogue, sp_ind = None, None  # unused by forward

    op, spop = interact_forward(chat_ids, speaker_info, sp_dialogue, sp_ind, inputs, params)
    jax.block_until_ready((op, spop))
    assert op.shape == (B, T, E) and spop.shape == (B, T, 2 * E)
    assert bool(jnp.all(jnp.isfinite(op))) and bool(jnp.all(jnp.isfinite(spop)))
    print("KERNEL_OK")
</pallas_src>

<mosaic_0001>
module attributes {stable_mosaic.version = 11 : i64} {
  func.func @interact_fused_kernel(%arg0: i32, %arg1: memref<8x8x1xi32, #tpu.memory_space<vmem>>, %arg2: memref<8x8x32xbf16, #tpu.memory_space<vmem>>, %arg3: memref<128x128xbf16, #tpu.memory_space<vmem>>, %arg4: memref<128x256xbf16, #tpu.memory_space<vmem>>, %arg5: memref<96x32xbf16, #tpu.memory_space<vmem>>, %arg6: memref<8x256xf32, #tpu.memory_space<vmem>>, %arg7: memref<8x8x32xf32, #tpu.memory_space<vmem>>, %arg8: memref<8x8x64xf32, #tpu.memory_space<vmem>>, %arg9: memref<8x8x32xf32, #tpu.memory_space<vmem>>, %arg10: memref<8x8x32xf32, #tpu.memory_space<vmem>>, %arg11: memref<8x8x32xf32, #tpu.memory_space<vmem>>, %arg12: memref<8x8x64xf32, #tpu.memory_space<vmem>>) attributes {dimension_semantics = [#tpu.dimension_semantics<parallel>], iteration_bounds = array<i64: 1>, scalar_prefetch = 0 : i64, scratch_operands = 4 : i64, tpu.core_type = #tpu.core_type<tc>, window_params = [{transform_indices = @transform_0, window_bounds = array<i64: 8, 8, 1>}, {transform_indices = @transform_1, window_bounds = array<i64: 8, 8, 32>}, {pipeline_mode = #tpu.pipeline_mode<synchronous>, transform_indices = @transform_2, window_bounds = array<i64: 128, 128>}, {pipeline_mode = #tpu.pipeline_mode<synchronous>, transform_indices = @transform_3, window_bounds = array<i64: 128, 256>}, {pipeline_mode = #tpu.pipeline_mode<synchronous>, transform_indices = @transform_4, window_bounds = array<i64: 96, 32>}, {pipeline_mode = #tpu.pipeline_mode<synchronous>, transform_indices = @transform_5, window_bounds = array<i64: 8, 256>}, {transform_indices = @transform_6, window_bounds = array<i64: 8, 8, 32>}, {transform_indices = @transform_7, window_bounds = array<i64: 8, 8, 64>}]} {
    %c0 = arith.constant 0 : index
    %c0_0 = arith.constant 0 : index
    %0 = vector.load %arg3[%c0, %c0_0] : memref<128x128xbf16, #tpu.memory_space<vmem>>, vector<128x128xbf16>
    %1 = vector.extract_strided_slice %0 {offsets = [0, 0], sizes = [32, 128], strides = [1, 1]} : vector<128x128xbf16> to vector<32x128xbf16>
    %2 = vector.extract_strided_slice %0 {offsets = [32, 0], sizes = [32, 128], strides = [1, 1]} : vector<128x128xbf16> to vector<32x128xbf16>
    %3 = vector.extract_strided_slice %0 {offsets = [64, 0], sizes = [64, 128], strides = [1, 1]} : vector<128x128xbf16> to vector<64x128xbf16>
    %4 = vector.extract_strided_slice %0 {offsets = [96, 0], sizes = [32, 128], strides = [1, 1]} : vector<128x128xbf16> to vector<32x128xbf16>
    %c0_1 = arith.constant 0 : index
    %c0_2 = arith.constant 0 : index
    %5 = vector.load %arg4[%c0_1, %c0_2] : memref<128x256xbf16, #tpu.memory_space<vmem>>, vector<128x256xbf16>
    %6 = vector.extract_strided_slice %5 {offsets = [0, 0], sizes = [32, 256], strides = [1, 1]} : vector<128x256xbf16> to vector<32x256xbf16>
    %7 = vector.extract_strided_slice %5 {offsets = [32, 0], sizes = [32, 256], strides = [1, 1]} : vector<128x256xbf16> to vector<32x256xbf16>
    %8 = vector.extract_strided_slice %5 {offsets = [64, 0], sizes = [64, 256], strides = [1, 1]} : vector<128x256xbf16> to vector<64x256xbf16>
    %c0_3 = arith.constant 0 : index
    %c0_4 = arith.constant 0 : index
    %9 = vector.load %arg5[%c0_3, %c0_4] : memref<96x32xbf16, #tpu.memory_space<vmem>>, vector<96x32xbf16>
    %10 = vector.extract_strided_slice %9 {offsets = [0, 0], sizes = [32, 32], strides = [1, 1]} : vector<96x32xbf16> to vector<32x32xbf16>
    %11 = vector.extract_strided_slice %9 {offsets = [32, 0], sizes = [32, 32], strides = [1, 1]} : vector<96x32xbf16> to vector<32x32xbf16>
    %12 = vector.extract_strided_slice %9 {offsets = [64, 0], sizes = [32, 32], strides = [1, 1]} : vector<96x32xbf16> to vector<32x32xbf16>
    %c0_5 = arith.constant 0 : index
    %c0_6 = arith.constant 0 : index
    %13 = vector.load %arg6[%c0_5, %c0_6] : memref<8x256xf32, #tpu.memory_space<vmem>>, vector<1x128xf32>
    %14 = vector.shape_cast %13 : vector<1x128xf32> to vector<1x128xf32>
    %15 = vector.broadcast %14 : vector<1x128xf32> to vector<8x128xf32>
    %c1 = arith.constant 1 : index
    %c0_7 = arith.constant 0 : index
    %16 = vector.load %arg6[%c1, %c0_7] : memref<8x256xf32, #tpu.memory_space<vmem>>, vector<1x256xf32>
    %17 = vector.shape_cast %16 : vector<1x256xf32> to vector<1x256xf32>
    %18 = vector.broadcast %17 : vector<1x256xf32> to vector<8x256xf32>
    %c2 = arith.constant 2 : index
    %c0_8 = arith.constant 0 : index
    %19 = vector.load %arg6[%c2, %c0_8] : memref<8x256xf32, #tpu.memory_space<vmem>>, vector<1x128xf32>
    %20 = vector.shape_cast %19 : vector<1x128xf32> to vector<1x128xf32>
    %21 = vector.broadcast %20 : vector<1x128xf32> to vector<8x128xf32>
    %c3 = arith.constant 3 : index
    %c0_9 = arith.constant 0 : index
    %22 = vector.load %arg6[%c3, %c0_9] : memref<8x256xf32, #tpu.memory_space<vmem>>, vector<1x32xf32>
    %23 = vector.shape_cast %22 : vector<1x32xf32> to vector<1x32xf32>
    %24 = vector.broadcast %23 : vector<1x32xf32> to vector<8x32xf32>
    %c4 = arith.constant 4 : index
    %c0_10 = arith.constant 0 : index
    %25 = vector.load %arg6[%c4, %c0_10] : memref<8x256xf32, #tpu.memory_space<vmem>>, vector<1x32xf32>
    %26 = vector.shape_cast %25 : vector<1x32xf32> to vector<1x32xf32>
    %27 = vector.broadcast %26 : vector<1x32xf32> to vector<8x32xf32>
    %c5 = arith.constant 5 : index
    %c0_11 = arith.constant 0 : index
    %28 = vector.load %arg6[%c5, %c0_11] : memref<8x256xf32, #tpu.memory_space<vmem>>, vector<1x32xf32>
    %29 = vector.shape_cast %28 : vector<1x32xf32> to vector<1x32xf32>
    %30 = vector.broadcast %29 : vector<1x32xf32> to vector<8x32xf32>
    %c6 = arith.constant 6 : index
    %c0_12 = arith.constant 0 : index
    %31 = vector.load %arg6[%c6, %c0_12] : memref<8x256xf32, #tpu.memory_space<vmem>>, vector<1x64xf32>
    %c7 = arith.constant 7 : index
    %c0_13 = arith.constant 0 : index
    %32 = vector.load %arg6[%c7, %c0_13] : memref<8x256xf32, #tpu.memory_space<vmem>>, vector<1x32xf32>
    %33 = vector.shape_cast %32 : vector<1x32xf32> to vector<1x32xf32>
    %34 = vector.broadcast %33 : vector<1x32xf32> to vector<8x32xf32>
    %35 = tpu.iota {dimensions = array<i32: 0>} : vector<8x8x1xi32>
    %36 = tpu.iota {dimensions = array<i32: 0>} : vector<8x8x1xi32>
    %cst = arith.constant 0.000000e+00 : f32
    %37 = vector.broadcast %cst : f32 to vector<8x32xf32>
    %c0_i32 = arith.constant 0 : i32
    %c8_i32 = arith.constant 8 : i32
    %38 = arith.addi %c0_i32, %c8_i32 : i32
    %c1_i32 = arith.constant 1 : i32
    %39:2 = scf.for %arg13 = %c0_i32 to %38 step %c1_i32 iter_args(%arg14 = %37, %arg15 = %37) -> (vector<8x32xf32>, vector<8x32xf32>)  : i32 {
      %52 = arith.index_cast %arg13 : i32 to index
      %c0_29 = arith.constant 0 : index
      %c0_30 = arith.constant 0 : index
      %53 = vector.load %arg2[%52, %c0_29, %c0_30] : memref<8x8x32xbf16, #tpu.memory_space<vmem>>, vector<1x8x32xbf16>
      %54 = vector.shape_cast %53 : vector<1x8x32xbf16> to vector<8x32xbf16>
      %cst_31 = arith.constant dense<0.000000e+00> : vector<8x128xf32>
      %55 = tpu.matmul %54, %1, %cst_31 {dimension_numbers = #tpu.dot_dimension_numbers<[1], [0], [0], [1], [0, 0, 1, 1], [], []>} : vector<8x32xbf16>, vector<32x128xbf16>, vector<8x128xf32> -> vector<8x128xf32>
      %56 = arith.addf %55, %15 : vector<8x128xf32>
      %57 = arith.truncf %arg14 : vector<8x32xf32> to vector<8x32xbf16>
      %cst_32 = arith.constant dense<0.000000e+00> : vector<8x128xf32>
      %58 = tpu.matmul %57, %2, %cst_32 {dimension_numbers = #tpu.dot_dimension_numbers<[1], [0], [0], [1], [0, 0, 1, 1], [], []>} : vector<8x32xbf16>, vector<32x128xbf16>, vector<8x128xf32> -> vector<8x128xf32>
      %59 = arith.addf %56, %58 : vector<8x128xf32>
      %60 = vector.extract_strided_slice %59 {offsets = [0, 0], sizes = [8, 32], strides = [1, 1]} : vector<8x128xf32> to vector<8x32xf32>
      %61 = arith.negf %60 : vector<8x32xf32>
      %62 = math.exp %61 : vector<8x32xf32>
      %cst_33 = arith.constant 1.000000e+00 : f32
      %63 = vector.broadcast %cst_33 : f32 to vector<8x32xf32>
      %64 = arith.addf %63, %62 : vector<8x32xf32>
      %65 = arith.divf %63, %64 : vector<8x32xf32>
      %66 = vector.extract_strided_slice %59 {offsets = [0, 32], sizes = [8, 32], strides = [1, 1]} : vector<8x128xf32> to vector<8x32xf32>
      %67 = arith.negf %66 : vector<8x32xf32>
      %68 = math.exp %67 : vector<8x32xf32>
      %cst_34 = arith.constant 1.000000e+00 : f32
      %69 = vector.broadcast %cst_34 : f32 to vector<8x32xf32>
      %70 = arith.addf %69, %68 : vector<8x32xf32>
      %71 = arith.divf %69, %70 : vector<8x32xf32>
      %72 = vector.extract_strided_slice %59 {offsets = [0, 64], sizes = [8, 32], strides = [1, 1]} : vector<8x128xf32> to vector<8x32xf32>
      %73 = math.tanh %72 : vector<8x32xf32>
      %74 = vector.extract_strided_slice %59 {offsets = [0, 96], sizes = [8, 32], strides = [1, 1]} : vector<8x128xf32> to vector<8x32xf32>
      %75 = arith.negf %74 : vector<8x32xf32>
      %76 = math.exp %75 : vector<8x32xf32>
      %cst_35 = arith.constant 1.000000e+00 : f32
      %77 = vector.broadcast %cst_35 : f32 to vector<8x32xf32>
      %78 = arith.addf %77, %76 : vector<8x32xf32>
      %79 = arith.divf %77, %78 : vector<8x32xf32>
      %80 = arith.mulf %71, %arg15 : vector<8x32xf32>
      %81 = arith.mulf %65, %73 : vector<8x32xf32>
      %82 = arith.addf %80, %81 : vector<8x32xf32>
      %83 = math.tanh %82 : vector<8x32xf32>
      %84 = arith.mulf %79, %83 : vector<8x32xf32>
      %85 = arith.index_cast %arg13 : i32 to index
      %c0_36 = arith.constant 0 : index
      %c0_37 = arith.constant 0 : index
      %86 = vector.load %arg9[%85, %c0_36, %c0_37] : memref<8x8x32xf32, #tpu.memory_space<vmem>>, vector<1x8x32xf32>
      %87 = vector.shape_cast %86 : vector<1x8x32xf32> to vector<8x32xf32>
      %88 = vector.shape_cast %84 : vector<8x32xf32> to vector<1x8x32xf32>
      tpu.vector_store %arg9[%85, %c0_36, %c0_37], %88 {strides = array<i32>} : memref<8x8x32xf32, #tpu.memory_space<vmem>>, vector<1x8x32xf32>,
      scf.yield %84, %82 : vector<8x32xf32>, vector<8x32xf32>
    }
    %c8_i32_14 = arith.constant 8 : i32
    %40 = vector.shape_cast %27 : vector<8x32xf32> to vector<1x8x32xf32>
    %41 = vector.broadcast %40 : vector<1x8x32xf32> to vector<8x8x32xf32>
    %c0_15 = arith.constant 0 : index
    %c0_16 = arith.constant 0 : index
    %c0_17 = arith.constant 0 : index
    %42 = vector.load %arg10[%c0_15, %c0_16, %c0_17] : memref<8x8x32xf32, #tpu.memory_space<vmem>>, vector<8x8x32xf32>
    tpu.vector_store %arg10[%c0_15, %c0_16, %c0_17], %41 {strides = array<i32>} : memref<8x8x32xf32, #tpu.memory_space<vmem>>, vector<8x8x32xf32>,
    %43 = vector.shape_cast %30 : vector<8x32xf32> to vector<1x8x32xf32>
    %44 = vector.broadcast %43 : vector<1x8x32xf32> to vector<8x8x32xf32>
    %c0_18 = arith.constant 0 : index
    %c0_19 = arith.constant 0 : index
    %c0_20 = arith.constant 0 : index
    %45 = vector.load %arg11[%c0_18, %c0_19, %c0_20] : memref<8x8x32xf32, #tpu.memory_space<vmem>>, vector<8x8x32xf32>
    tpu.vector_store %arg11[%c0_18, %c0_19, %c0_20], %44 {strides = array<i32>} : memref<8x8x32xf32, #tpu.memory_space<vmem>>, vector<8x8x32xf32>,
    %46 = vector.shape_cast %31 : vector<1x64xf32> to vector<1x1x64xf32>
    %47 = vector.broadcast %46 : vector<1x1x64xf32> to vector<8x8x64xf32>
    %c0_21 = arith.constant 0 : index
    %c0_22 = arith.constant 0 : index
    %c0_23 = arith.constant 0 : index
    %48 = vector.load %arg12[%c0_21, %c0_22, %c0_23] : memref<8x8x64xf32, #tpu.memory_space<vmem>>, vector<8x8x64xf32>
    tpu.vector_store %arg12[%c0_21, %c0_22, %c0_23], %47 {strides = array<i32>} : memref<8x8x64xf32, #tpu.memory_space<vmem>>, vector<8x8x64xf32>,
    %cst_24 = arith.constant 0.000000e+00 : f32
    %49 = vector.broadcast %cst_24 : f32 to vector<8x64xf32>
    %c0_i32_25 = arith.constant 0 : i32
    %c8_i32_26 = arith.constant 8 : i32
    %50 = arith.addi %c0_i32_25, %c8_i32_26 : i32
    %c1_i32_27 = arith.constant 1 : i32
    %51 = scf.for %arg13 = %c0_i32_25 to %50 step %c1_i32_27 iter_args(%arg14 = %49) -> (vector<8x64xf32>)  : i32 {
      %52 = arith.index_cast %arg13 : i32 to index
      %c0_29 = arith.constant 0 : index
      %c0_30 = arith.constant 0 : index
      %53 = vector.load %arg9[%52, %c0_29, %c0_30] : memref<8x8x32xf32, #tpu.memory_space<vmem>>, vector<1x8x32xf32>
      %54 = vector.shape_cast %53 : vector<1x8x32xf32> to vector<8x32xf32>
      %55 = arith.truncf %54 : vector<8x32xf32> to vector<8x32xbf16>
      %cst_31 = arith.constant dense<0.000000e+00> : vector<8x32xf32>
      %56 = tpu.matmul %55, %10, %cst_31 {dimension_numbers = #tpu.dot_dimension_numbers<[1], [0], [0], [1], [0, 0, 1, 1], [], []>} : vector<8x32xbf16>, vector<32x32xbf16>, vector<8x32xf32> -> vector<8x32xf32>
      %57 = arith.addf %56, %24 : vector<8x32xf32>
      %cst_32 = arith.constant dense<0.000000e+00> : vector<8x256xf32>
      %58 = tpu.matmul %55, %7, %cst_32 {dimension_numbers = #tpu.dot_dimension_numbers<[1], [0], [0], [1], [0, 0, 1, 1], [], []>} : vector<8x32xbf16>, vector<32x256xbf16>, vector<8x256xf32> -> vector<8x256xf32>
      %59 = arith.addf %58, %18 : vector<8x256xf32>
      %cst_33 = arith.constant dense<0.000000e+00> : vector<8x128xf32>
      %60 = tpu.matmul %55, %4, %cst_33 {dimension_numbers = #tpu.dot_dimension_numbers<[1], [0], [0], [1], [0, 0, 1, 1], [], []>} : vector<8x32xbf16>, vector<32x128xbf16>, vector<8x128xf32> -> vector<8x128xf32>
      %61 = arith.addf %60, %21 : vector<8x128xf32>
      %c0_34 = arith.constant 0 : index
      %c0_35 = arith.constant 0 : index
      %c0_36 = arith.constant 0 : index
      %62 = vector.load %arg10[%c0_34, %c0_35, %c0_36] : memref<8x8x32xf32, #tpu.memory_space<vmem>>, vector<8x8x32xf32>
      %c0_37 = arith.constant 0 : index
      %c0_38 = arith.constant 0 : index
      %c0_39 = arith.constant 0 : index
      %63 = vector.load %arg11[%c0_37, %c0_38, %c0_39] : memref<8x8x32xf32, #tpu.memory_space<vmem>>, vector<8x8x32xf32>
      %64 = vector.shape_cast %57 : vector<8x32xf32> to vector<1x8x32xf32>
      %65 = vector.broadcast %64 : vector<1x8x32xf32> to vector<8x8x32xf32>
      %66 = arith.mulf %62, %65 : vector<8x8x32xf32>
      %cst_40 = arith.constant dense<0.000000e+00> : vector<8x8xf32>
      %67 = vector.multi_reduction <add>, %66, %cst_40 [2] : vector<8x8x32xf32> to vector<8x8xf32>
      %68 = vector.shape_cast %67 : vector<8x8xf32> to vector<8x8x1xf32>
      %cst_41 = arith.constant 0.176776692 : f32
      %69 = vector.broadcast %cst_41 : f32 to vector<8x8x1xf32>
      %70 = arith.mulf %68, %69 : vector<8x8x1xf32>
      %71 = vector.broadcast %arg13 : i32 to vector<8x8x1xi32>
      %72 = arith.cmpi sle, %35, %71 : vector<8x8x1xi32>
      %cst_42 = arith.constant -1.000000e+09 : f32
      %73 = vector.broadcast %cst_42 : f32 to vector<8x8x1xf32>
      %74 = arith.select %72, %70, %73 : vector<8x8x1xi1>, vector<8x8x1xf32>
      %cst_43 = arith.constant dense<0xFF800000> : vector<8x1xf32>
      %75 = vector.multi_reduction <maximumf>, %74, %cst_43 [0] : vector<8x8x1xf32> to vector<8x1xf32>
      %76 = vector.shape_cast %75 : vector<8x1xf32> to vector<1x8x1xf32>
      %77 = vector.broadcast %76 : vector<1x8x1xf32> to vector<8x8x1xf32>
      %78 = arith.subf %74, %77 : vector<8x8x1xf32>
      %79 = math.exp %78 : vector<8x8x1xf32>
      %cst_44 = arith.constant dense<0.000000e+00> : vector<8x1xf32>
      %80 = vector.multi_reduction <add>, %79, %cst_44 [0] : vector<8x8x1xf32> to vector<8x1xf32>
      %81 = vector.shape_cast %80 : vector<8x1xf32> to vector<1x8x1xf32>
      %82 = tpu.reciprocal %81 {approx = true} : vector<1x8x1xf32> -> vector<1x8x1xf32>
      %83 = vector.broadcast %82 : vector<1x8x1xf32> to vector<8x8x1xf32>
      %84 = arith.mulf %79, %83 : vector<8x8x1xf32>
      %85 = vector.broadcast %84 : vector<8x8x1xf32> to vector<8x8x32xf32>
      %86 = arith.mulf %85, %63 : vector<8x8x32xf32>
      %cst_45 = arith.constant dense<0.000000e+00> : vector<8x32xf32>
      %87 = vector.multi_reduction <add>, %86, %cst_45 [0] : vector<8x8x32xf32> to vector<8x32xf32>
      %c0_i32_46 = arith.constant 0 : i32
      %88 = arith.cmpi eq, %arg13, %c0_i32_46 : i32
      %89 = arith.select %88, %34, %87 : vector<8x32xf32>
      %90 = arith.index_cast %arg13 : i32 to index
      %c0_47 = arith.constant 0 : index
      %c0_48 = arith.constant 0 : index
      %91 = vector.load %arg1[%90, %c0_47, %c0_48] : memref<8x8x1xi32, #tpu.memory_space<vmem>>, vector<1x8x1xi32>
      %92 = vector.shape_cast %91 : vector<1x8x1xi32> to vector<8x1xi32>
      %93 = vector.shape_cast %92 : vector<8x1xi32> to vector<1x8x1xi32>
      %94 = vector.broadcast %93 : vector<1x8x1xi32> to vector<8x8x1xi32>
      %95 = arith.cmpi eq, %36, %94 : vector<8x8x1xi32>
      %c0_49 = arith.constant 0 : index
      %c0_50 = arith.constant 0 : index
      %c0_51 = arith.constant 0 : index
      %96 = vector.load %arg12[%c0_49, %c0_50, %c0_51] : memref<8x8x64xf32, #tpu.memory_space<vmem>>, vector<8x8x64xf32>
      %cst_52 = arith.constant 0.000000e+00 : f32
      %97 = vector.shape_cast %95 : vector<8x8x1xi1> to vector<8x8x1xi1>
      %98 = vector.broadcast %97 : vector<8x8x1xi1> to vector<8x8x64xi1>
      %99 = vector.broadcast %cst_52 : f32 to vector<8x8x64xf32>
      %100 = arith.select %98, %96, %99 : vector<8x8x64xi1>, vector<8x8x64xf32>
      %cst_53 = arith.constant dense<0.000000e+00> : vector<8x64xf32>
      %101 = vector.multi_reduction <add>, %100, %cst_53 [0] : vector<8x8x64xf32> to vector<8x64xf32>
      %102 = arith.truncf %89 : vector<8x32xf32> to vector<8x32xbf16>
      %cst_54 = arith.constant dense<0.000000e+00> : vector<8x256xf32>
      %103 = tpu.matmul %102, %6, %cst_54 {dimension_numbers = #tpu.dot_dimension_numbers<[1], [0], [0], [1], [0, 0, 1, 1], [], []>} : vector<8x32xbf16>, vector<32x256xbf16>, vector<8x256xf32> -> vector<8x256xf32>
      %104 = arith.truncf %101 : vector<8x64xf32> to vector<8x64xbf16>
      %cst_55 = arith.constant dense<0.000000e+00> : vector<8x256xf32>
      %105 = tpu.matmul %104, %8, %cst_55 {dimension_numbers = #tpu.dot_dimension_numbers<[1], [0], [0], [1], [0, 0, 1, 1], [], []>} : vector<8x64xbf16>, vector<64x256xbf16>, vector<8x256xf32> -> vector<8x256xf32>
      %106 = arith.addf %103, %105 : vector<8x256xf32>
      %107 = arith.addf %106, %59 : vector<8x256xf32>
      %108 = vector.extract_strided_slice %107 {offsets = [0, 0], sizes = [8, 64], strides = [1, 1]} : vector<8x256xf32> to vector<8x64xf32>
      %109 = arith.negf %108 : vector<8x64xf32>
      %110 = math.exp %109 : vector<8x64xf32>
      %cst_56 = arith.constant 1.000000e+00 : f32
      %111 = vector.broadcast %cst_56 : f32 to vector<8x64xf32>
      %112 = arith.addf %111, %110 : vector<8x64xf32>
      %113 = arith.divf %111, %112 : vector<8x64xf32>
      %114 = vector.extract_strided_slice %107 {offsets = [0, 64], sizes = [8, 64], strides = [1, 1]} : vector<8x256xf32> to vector<8x64xf32>
      %115 = arith.negf %114 : vector<8x64xf32>
      %116 = math.exp %115 : vector<8x64xf32>
      %cst_57 = arith.constant 1.000000e+00 : f32
      %117 = vector.broadcast %cst_57 : f32 to vector<8x64xf32>
      %118 = arith.addf %117, %116 : vector<8x64xf32>
      %119 = arith.divf %117, %118 : vector<8x64xf32>
      %120 = vector.extract_strided_slice %107 {offsets = [0, 128], sizes = [8, 64], strides = [1, 1]} : vector<8x256xf32> to vector<8x64xf32>
      %121 = math.tanh %120 : vector<8x64xf32>
      %122 = vector.extract_strided_slice %107 {offsets = [0, 192], sizes = [8, 64], strides = [1, 1]} : vector<8x256xf32> to vector<8x64xf32>
      %123 = arith.negf %122 : vector<8x64xf32>
      %124 = math.exp %123 : vector<8x64xf32>
      %cst_58 = arith.constant 1.000000e+00 : f32
      %125 = vector.broadcast %cst_58 : f32 to vector<8x64xf32>
      %126 = arith.addf %125, %124 : vector<8x64xf32>
      %127 = arith.divf %125, %126 : vector<8x64xf32>
      %128 = arith.mulf %119, %arg14 : vector<8x64xf32>
      %129 = arith.mulf %113, %121 : vector<8x64xf32>
      %130 = arith.addf %128, %129 : vector<8x64xf32>
      %131 = math.tanh %130 : vector<8x64xf32>
      %132 = arith.mulf %127, %131 : vector<8x64xf32>
      %133 = vector.shape_cast %132 : vector<8x64xf32> to vector<1x8x64xf32>
      %134 = vector.shape_cast %95 : vector<8x8x1xi1> to vector<8x8x1xi1>
      %135 = vector.broadcast %134 : vector<8x8x1xi1> to vector<8x8x64xi1>
      %136 = vector.shape_cast %133 : vector<1x8x64xf32> to vector<1x8x64xf32>
      %137 = vector.broadcast %136 : vector<1x8x64xf32> to vector<8x8x64xf32>
      %138 = arith.select %135, %137, %96 : vector<8x8x64xi1>, vector<8x8x64xf32>
      %c0_59 = arith.constant 0 : index
      %c0_60 = arith.constant 0 : index
      %c0_61 = arith.constant 0 : index
      %139 = vector.load %arg12[%c0_59, %c0_60, %c0_61] : memref<8x8x64xf32, #tpu.memory_space<vmem>>, vector<8x8x64xf32>
      tpu.vector_store %arg12[%c0_59, %c0_60, %c0_61], %138 {strides = array<i32>} : memref<8x8x64xf32, #tpu.memory_space<vmem>>, vector<8x8x64xf32>,
      %140 = tpu.concatenate %34, %54 in 1 : vector<8x32xf32>, vector<8x32xf32> -> vector<8x64xf32>
      %141 = arith.addf %132, %140 : vector<8x64xf32>
      %142 = arith.index_cast %arg13 : i32 to index
      %c0_62 = arith.constant 0 : index
      %c0_63 = arith.constant 0 : index
      %143 = vector.load %arg8[%142, %c0_62, %c0_63] : memref<8x8x64xf32, #tpu.memory_space<vmem>>, vector<1x8x64xf32>
      %144 = vector.shape_cast %143 : vector<1x8x64xf32> to vector<8x64xf32>
      %145 = vector.shape_cast %141 : vector<8x64xf32> to vector<1x8x64xf32>
      tpu.vector_store %arg8[%142, %c0_62, %c0_63], %145 {strides = array<i32>} : memref<8x8x64xf32, #tpu.memory_space<vmem>>, vector<1x8x64xf32>,
      %146 = arith.truncf %132 : vector<8x64xf32> to vector<8x64xbf16>
      %cst_64 = arith.constant dense<0.000000e+00> : vector<8x128xf32>
      %147 = tpu.matmul %146, %3, %cst_64 {dimension_numbers = #tpu.dot_dimension_numbers<[1], [0], [0], [1], [0, 0, 1, 1], [], []>} : vector<8x64xbf16>, vector<64x128xbf16>, vector<8x128xf32> -> vector<8x128xf32>
      %148 = arith.addf %147, %61 : vector<8x128xf32>
      %149 = arith.sitofp %arg13 : i32 to f32
      %cst_65 = arith.constant 1.000000e+00 : f32
      %150 = arith.addf %cst_65, %149 : f32
      %cst_66 = arith.constant 1.000000e+00 : f32
      %151 = arith.divf %cst_66, %150 : f32
      %152 = vector.extract_strided_slice %130 {offsets = [0, 0], sizes = [8, 32], strides = [1, 1]} : vector<8x64xf32> to vector<8x32xf32>
      %153 = vector.broadcast %151 : f32 to vector<8x32xf32>
      %154 = arith.mulf %152, %153 : vector<8x32xf32>
      %155 = vector.extract_strided_slice %148 {offsets = [0, 0], sizes = [8, 32], strides = [1, 1]} : vector<8x128xf32> to vector<8x32xf32>
      %156 = arith.negf %155 : vector<8x32xf32>
      %157 = math.exp %156 : vector<8x32xf32>
      %cst_67 = arith.constant 1.000000e+00 : f32
      %158 = vector.broadcast %cst_67 : f32 to vector<8x32xf32>
      %159 = arith.addf %158, %157 : vector<8x32xf32>
      %160 = arith.divf %158, %159 : vector<8x32xf32>
      %161 = vector.extract_strided_slice %148 {offsets = [0, 32], sizes = [8, 32], strides = [1, 1]} : vector<8x128xf32> to vector<8x32xf32>
      %162 = arith.negf %161 : vector<8x32xf32>
      %163 = math.exp %162 : vector<8x32xf32>
      %cst_68 = arith.constant 1.000000e+00 : f32
      %164 = vector.broadcast %cst_68 : f32 to vector<8x32xf32>
      %165 = arith.addf %164, %163 : vector<8x32xf32>
      %166 = arith.divf %164, %165 : vector<8x32xf32>
      %167 = vector.extract_strided_slice %148 {offsets = [0, 64], sizes = [8, 32], strides = [1, 1]} : vector<8x128xf32> to vector<8x32xf32>
      %168 = math.tanh %167 : vector<8x32xf32>
      %169 = vector.extract_strided_slice %148 {offsets = [0, 96], sizes = [8, 32], strides = [1, 1]} : vector<8x128xf32> to vector<8x32xf32>
      %170 = arith.negf %169 : vector<8x32xf32>
      %171 = math.exp %170 : vector<8x32xf32>
      %cst_69 = arith.constant 1.000000e+00 : f32
      %172 = vector.broadcast %cst_69 : f32 to vector<8x32xf32>
      %173 = arith.addf %172, %171 : vector<8x32xf32>
      %174 = arith.divf %172, %173 : vector<8x32xf32>
      %175 = arith.mulf %166, %154 : vector<8x32xf32>
      %176 = arith.mulf %160, %168 : vector<8x32xf32>
      %177 = arith.addf %175, %176 : vector<8x32xf32>
      %178 = math.tanh %177 : vector<8x32xf32>
      %179 = arith.mulf %174, %178 : vector<8x32xf32>
      %180 = arith.index_cast %arg13 : i32 to index
      %c0_70 = arith.constant 0 : index
      %c0_71 = arith.constant 0 : index
      %181 = vector.load %arg7[%180, %c0_70, %c0_71] : memref<8x8x32xf32, #tpu.memory_space<vmem>>, vector<1x8x32xf32>
      %182 = vector.shape_cast %181 : vector<1x8x32xf32> to vector<8x32xf32>
      %183 = vector.shape_cast %179 : vector<8x32xf32> to vector<1x8x32xf32>
      tpu.vector_store %arg7[%180, %c0_70, %c0_71], %183 {strides = array<i32>} : memref<8x8x32xf32, #tpu.memory_space<vmem>>, vector<1x8x32xf32>,
      %184 = arith.truncf %179 : vector<8x32xf32> to vector<8x32xbf16>
      %cst_72 = arith.constant dense<0.000000e+00> : vector<8x32xf32>
      %185 = tpu.matmul %184, %11, %cst_72 {dimension_numbers = #tpu.dot_dimension_numbers<[1], [0], [0], [1], [0, 0, 1, 1], [], []>} : vector<8x32xbf16>, vector<32x32xbf16>, vector<8x32xf32> -> vector<8x32xf32>
      %186 = arith.addf %185, %27 : vector<8x32xf32>
      %187 = arith.index_cast %arg13 : i32 to index
      %c0_73 = arith.constant 0 : index
      %c0_74 = arith.constant 0 : index
      %188 = vector.load %arg10[%187, %c0_73, %c0_74] : memref<8x8x32xf32, #tpu.memory_space<vmem>>, vector<1x8x32xf32>
      %189 = vector.shape_cast %188 : vector<1x8x32xf32> to vector<8x32xf32>
      %190 = vector.shape_cast %186 : vector<8x32xf32> to vector<1x8x32xf32>
      tpu.vector_store %arg10[%187, %c0_73, %c0_74], %190 {strides = array<i32>} : memref<8x8x32xf32, #tpu.memory_space<vmem>>, vector<1x8x32xf32>,
      %cst_75 = arith.constant dense<0.000000e+00> : vector<8x32xf32>
      %191 = tpu.matmul %184, %12, %cst_75 {dimension_numbers = #tpu.dot_dimension_numbers<[1], [0], [0], [1], [0, 0, 1, 1], [], []>} : vector<8x32xbf16>, vector<32x32xbf16>, vector<8x32xf32> -> vector<8x32xf32>
      %192 = arith.addf %191, %30 : vector<8x32xf32>
      %193 = arith.index_cast %arg13 : i32 to index
      %c0_76 = arith.constant 0 : index
      %c0_77 = arith.constant 0 : index
      %194 = vector.load %arg11[%193, %c0_76, %c0_77] : memref<8x8x32xf32, #tpu.memory_space<vmem>>, vector<1x8x32xf32>
      %195 = vector.shape_cast %194 : vector<1x8x32xf32> to vector<8x32xf32>
      %196 = vector.shape_cast %192 : vector<8x32xf32> to vector<1x8x32xf32>
      tpu.vector_store %arg11[%193, %c0_76, %c0_77], %196 {strides = array<i32>} : memref<8x8x32xf32, #tpu.memory_space<vmem>>, vector<1x8x32xf32>,
      scf.yield %130 : vector<8x64xf32>
    }
    %c8_i32_28 = arith.constant 8 : i32
    return
  }
  func.func @transform_0(%arg0: i32) -> (i32, i32, i32) {
    %c0_i32 = arith.constant 0 : i32
    %c0_i32_0 = arith.constant 0 : i32
    %c0_i32_1 = arith.constant 0 : i32
    return %c0_i32, %arg0, %c0_i32_0 : i32, i32, i32
  }
  func.func @transform_1(%arg0: i32) -> (i32, i32, i32) {
    %c0_i32 = arith.constant 0 : i32
    %c0_i32_0 = arith.constant 0 : i32
    %c0_i32_1 = arith.constant 0 : i32
    return %c0_i32, %arg0, %c0_i32_0 : i32, i32, i32
  }
  func.func @transform_2(%arg0: i32) -> (i32, i32) {
    %c0_i32 = arith.constant 0 : i32
    %c0_i32_0 = arith.constant 0 : i32
    %c0_i32_1 = arith.constant 0 : i32
    return %c0_i32, %c0_i32_0 : i32, i32
  }
  func.func @transform_3(%arg0: i32) -> (i32, i32) {
    %c0_i32 = arith.constant 0 : i32
    %c0_i32_0 = arith.constant 0 : i32
    %c0_i32_1 = arith.constant 0 : i32
    return %c0_i32, %c0_i32_0 : i32, i32
  }
  func.func @transform_4(%arg0: i32) -> (i32, i32) {
    %c0_i32 = arith.constant 0 : i32
    %c0_i32_0 = arith.constant 0 : i32
    %c0_i32_1 = arith.constant 0 : i32
    return %c0_i32, %c0_i32_0 : i32, i32
  }
  func.func @transform_5(%arg0: i32) -> (i32, i32) {
    %c0_i32 = arith.constant 0 : i32
    %c0_i32_0 = arith.constant 0 : i32
    %c0_i32_1 = arith.constant 0 : i32
    return %c0_i32, %c0_i32_0 : i32, i32
  }
  func.func @transform_6(%arg0: i32) -> (i32, i32, i32) {
    %c0_i32 = arith.constant 0 : i32
    %c0_i32_0 = arith.constant 0 : i32
    %c0_i32_1 = arith.constant 0 : i32
    return %c0_i32, %arg0, %c0_i32_0 : i32, i32, i32
  }
  func.func @transform_7(%arg0: i32) -> (i32, i32, i32) {
    %c0_i32 = arith.constant 0 : i32
    %c0_i32_0 = arith.constant 0 : i32
    %c0_i32_1 = arith.constant 0 : i32
    return %c0_i32, %arg0, %c0_i32_0 : i32, i32, i32
  }
}

</mosaic_0001>

<bundles_post_ra>
// kernel: tpu_custom_call.1
= control target key start
LH: loop header
LB: loop body
LE: loop exit
PB: predicated region body
PF: predicated region fallthrough
CT: control target
= control target key end

     0   :  { %13 = vsyncpa [#allocation7], 0  ;;  %s2380_s0 = inlined_call_operand.vmem [shape: s32[8,8,1], index: 0, kind: input, shape index: {}]   ;;  %s2381_s1 = inlined_call_operand.hbm [shape: bf16[8,8,32], index: 1, kind: input, shape index: {}]   ;;  %s2382_s2 = inlined_call_operand.hbm [shape: bf16[128,128], index: 2, kind: input, shape index: {}]   ;;  %s2383_s3 = inlined_call_operand.vmem [shape: bf16[128,256], index: 3, kind: input, shape index: {}]   ;;  %s2384_s4 = inlined_call_operand.vmem [shape: bf16[96,32], index: 4, kind: input, shape index: {}]   ;;  %s2385_s5 = inlined_call_operand.vmem [shape: f32[8,256], index: 5, kind: input, shape index: {}]   ;;  %s2386_s6 = inlined_call_operand.hbm [shape: f32[8,8,32], index: 6, kind: output, shape index: {0}]   ;;  %s2387_s7 = inlined_call_operand.hbm [shape: f32[8,8,64], index: 7, kind: output, shape index: {1}]  }
   0x1   :  { %14 = vsyncpa [#allocation10], 0 }
   0x2   :  { %15 = vsyncpa [#allocation8], 0 }
   0x3   :  { %16 = vsyncpa [#allocation13], 0  ;;  %s1660_s24 = smov [#allocation6]   ;;  %s1524_s28 = scalar_lea.hbm %s2381_s1, 512 }
   0x4   :  { %s24_s25 = sshll.u32 %s1660_s24, 4  ;;  %p1525_p0 = scmp.ne.s32.totalorder %s2381_s1, %s1524_s28  ;;  %s25_s25 = int_to_ptr.vmem [resolvable:$true] %s24_s25 }
   0x5   :  { %p1528_p1 = scmp.lt.u32.totalorder %s1524_s28, %s2381_s1 }
   0x7   :  { %p1530_p2 = pnand %p1528_p1, %p1525_p0 }
   0x9   :  { %1533 = shalt.err (!%p1530_p2)
}
   0xa   :  { %s1534_s10 = scalar_lea.vmem %s25_s25, 512  ;;  %p1539_p4 = scmp.lt.s32.totalorder %s25_s25, %s25_s25 }
   0xb   :  { %p1535_p3 = scmp.ne.s32.totalorder %s25_s25, %s1534_s10  ;;  %p1540_p5 = scmp.lt.s32.totalorder %s1534_s10, %s1534_s10 }
   0xd   :  { %p1541_p6 = por %p1540_p5, %p1539_p4 }
   0xf   :  { %p1542_p7 = pnand %p1541_p6, %p1535_p3 }
  0x11   :  { %1545 = shalt.err (!%p1542_p7)
}
  0x12   :  { %s1661_s11 = smov 64   ;;  %s1662_s12 = smov 4  }
  0x13   :  { %30 = dma.hbm_to_vmem [thread:$0]  %s2381_s1, 512, %s25_s25, [#allocation7], %s1661_s11, %s1661_s11, %s1662_s12  }
  0x14   :  { %s1663_s15 = smov [#allocation9]   ;;  %s1546_s19 = scalar_lea.hbm %s2382_s2, 1024 }
  0x15   :  { %s36_s16 = sshll.u32 %s1663_s15, 4  ;;  %p1547_p8 = scmp.ne.s32.totalorder %s2382_s2, %s1546_s19  ;;  %s37_s16 = int_to_ptr.vmem [resolvable:$true] %s36_s16 }
  0x16   :  { %p1550_p9 = scmp.lt.u32.totalorder %s1546_s19, %s2382_s2 }
  0x18   :  { %p1552_p10 = pnand %p1550_p9, %p1547_p8 }
  0x1a   :  { %1555 = shalt.err (!%p1552_p10)
}
  0x1b   :  { %s1556_s24 = scalar_lea.vmem %s37_s16, 1024  ;;  %p1561_p12 = scmp.lt.s32.totalorder %s37_s16, %s37_s16 }
  0x1c   :  { %p1557_p11 = scmp.ne.s32.totalorder %s37_s16, %s1556_s24  ;;  %p1562_p13 = scmp.lt.s32.totalorder %s1556_s24, %s1556_s24 }
  0x1e   :  { %p1563_p0 = por %p1562_p13, %p1561_p12 }
  0x20   :  { %p1564_p1 = pnand %p1563_p0, %p1557_p11 }
  0x22   :  { %1567 = shalt.err (!%p1564_p1)
}
  0x23   :  { %42 = dma.hbm_to_vmem [thread:$0]  %s2382_s2, 1024, %s37_s16, [#allocation10], %s1661_s11, %s1661_s11, %s1662_s12  }
  0x24   :  { %1632 = dma.done.wait [#allocation7], 512  }
  0x25   :  { %1633 = vsyncadd [#allocation7], 4294966784 }
  0x26   :  { %1634 = dma.done.wait [#allocation10], 1024  }
  0x27   :  { %1635 = vsyncadd [#allocation10], 4294966272  ;;  %v1742_v0 = vld [vmem:[#allocation9] sm:$0xf]  ;;  %v1744_v1 = vld [vmem:[#allocation9 + $0x4] sm:$0xf]  ;;  %v104_v9 = vlaneseq }
  0x28   :  { %2415 = vst [vmem:[#allocation18_spill] sm:$0xff] %v1742_v0  ;;  %2416 = vst [vmem:[#allocation19_spill] sm:$0xff] %v1744_v1  ;;  %v1746_v2 = vld [vmem:[#allocation9 + $0x8] sm:$0xf]  ;;  %v1748_v3 = vld [vmem:[#allocation9 + $0xc] sm:$0xf] }
  0x29   :  { %2417 = vst [vmem:[#allocation20_spill] sm:$0xff] %v1746_v2  ;;  %2418 = vst [vmem:[#allocation21_spill] sm:$0xff] %v1748_v3  ;;  %v1750_v4 = vld [vmem:[#allocation9 + $0x10] sm:$0xf]  ;;  %v1752_v5 = vld [vmem:[#allocation9 + $0x14] sm:$0xf] }
  0x2a   :  { %v1754_v6 = vld [vmem:[#allocation9 + $0x18] sm:$0xf]  ;;  %v1756_v7 = vld [vmem:[#allocation9 + $0x1c] sm:$0xf]  ;;  %v1758_v8 = vld [vmem:[#allocation9 + $0x20] sm:$0xf] }
  0x2b   :  { %v1760_v10 = vld [vmem:[#allocation9 + $0x24] sm:$0xf]  ;;  %v1762_v11 = vld [vmem:[#allocation9 + $0x28] sm:$0xf]  ;;  %v1764_v12 = vld [vmem:[#allocation9 + $0x2c] sm:$0xf] }
  0x2c   :  { %v1766_v13 = vld [vmem:[#allocation9 + $0x30] sm:$0xf]  ;;  %v1768_v14 = vld [vmem:[#allocation9 + $0x34] sm:$0xf]  ;;  %v1770_v15 = vld [vmem:[#allocation9 + $0x38] sm:$0xf] }
  0x2d   :  { %v1772_v16 = vld [vmem:[#allocation9 + $0x3c] sm:$0xf]  ;;  %v1777_v17 = vld [vmem:[%s2383_s3] sm:$0xff]  ;;  %v1782_v18 = vld [vmem:[%s2383_s3 + $0x8] sm:$0xff]  ;;  %v105_v22 = vshrl.u32 %v104_v9, 7  ;;  %v1956_v58 = vmov 0.0  }
  0x2e   :  { %2419 = vst [vmem:[#allocation22_spill] sm:$0xff] %v1777_v17  ;;  %2420 = vst [vmem:[#allocation23_spill] sm:$0xff] %v1782_v18  ;;  %v1787_v19 = vld [vmem:[%s2383_s3 + $0x10] sm:$0xff]  ;;  %v1792_v20 = vld [vmem:[%s2383_s3 + $0x18] sm:$0xff]  ;;  %v1958_v59 = vmov 0.0   ;;  %s1960_s21 = smov 0  }
  0x2f   :  { %2421 = vst [vmem:[#allocation24_spill] sm:$0xff] %v1787_v19  ;;  %2422 = vst [vmem:[#allocation25_spill] sm:$0xff] %v1792_v20  ;;  %v1797_v21 = vld [vmem:[%s2383_s3 + $0x20] sm:$0xff]  ;;  %v1802_v23 = vld [vmem:[%s2383_s3 + $0x28] sm:$0xff]  ;;  %v106_v35 = vsub.s32 0, %v105_v22  ;;  %v110_v36 = vsub.s32 1, %v105_v22 }
  0x30   :  { %2423 = vst [vmem:[#allocation26_spill] sm:$0xff] %v1797_v21  ;;  %2424 = vst [vmem:[#allocation27_spill] sm:$0xff] %v1802_v23  ;;  %v1807_v24 = vld [vmem:[%s2383_s3 + $0x30] sm:$0xff]  ;;  %v1812_v25 = vld [vmem:[%s2383_s3 + $0x38] sm:$0xff] }
  0x31   :  { %2425 = vst [vmem:[#allocation28_spill] sm:$0xff] %v1807_v24  ;;  %2426 = vst [vmem:[#allocation29_spill] sm:$0xff] %v1812_v25  ;;  %v1817_v26 = vld [vmem:[%s2383_s3 + $0x40] sm:$0xff]  ;;  %v1822_v27 = vld [vmem:[%s2383_s3 + $0x48] sm:$0xff] }
  0x32   :  { %2427 = vst [vmem:[#allocation30_spill] sm:$0xff] %v1817_v26  ;;  %2428 = vst [vmem:[#allocation31_spill] sm:$0xff] %v1822_v27  ;;  %v1827_v28 = vld [vmem:[%s2383_s3 + $0x50] sm:$0xff]  ;;  %v1832_v29 = vld [vmem:[%s2383_s3 + $0x58] sm:$0xff] }
  0x33   :  { %2429 = vst [vmem:[#allocation32_spill] sm:$0xff] %v1827_v28  ;;  %2430 = vst [vmem:[#allocation33_spill] sm:$0xff] %v1832_v29  ;;  %v1837_v30 = vld [vmem:[%s2383_s3 + $0x60] sm:$0xff]  ;;  %v1842_v31 = vld [vmem:[%s2383_s3 + $0x68] sm:$0xff] }
  0x34   :  { %2431 = vst [vmem:[#allocation34_spill] sm:$0xff] %v1837_v30  ;;  %2432 = vst [vmem:[#allocation35_spill] sm:$0xff] %v1842_v31  ;;  %v1847_v32 = vld [vmem:[%s2383_s3 + $0x70] sm:$0xff]  ;;  %v1852_v33 = vld [vmem:[%s2383_s3 + $0x78] sm:$0xff] }
  0x35   :  { %2433 = vst [vmem:[#allocation36_spill] sm:$0xff] %v1847_v32  ;;  %2434 = vst [vmem:[#allocation37_spill] sm:$0xff] %v1852_v33  ;;  %v1857_v34 = vld [vmem:[%s2384_s4] sm:$0xf]  ;;  %v1862_v37 = vld [vmem:[%s2384_s4 + $0x4] sm:$0xf] }
  0x36   :  { %2435 = vst [vmem:[#allocation38_spill] sm:$0xff] %v1857_v34  ;;  %2436 = vst [vmem:[#allocation39_spill] sm:$0xff] %v1862_v37  ;;  %v1867_v38 = vld [vmem:[%s2384_s4 + $0x8] sm:$0xf]  ;;  %v1872_v39 = vld [vmem:[%s2384_s4 + $0xc] sm:$0xf] }
  0x37   :  { %2437 = vst [vmem:[#allocation40_spill] sm:$0xff] %v1867_v38  ;;  %2438 = vst [vmem:[#allocation41_spill] sm:$0xff] %v1872_v39  ;;  %v1877_v40 = vld [vmem:[%s2384_s4 + $0x10] sm:$0xf]  ;;  %v1882_v41 = vld [vmem:[%s2384_s4 + $0x14] sm:$0xf] }
  0x38   :  { %v1887_v42 = vld [vmem:[%s2384_s4 + $0x18] sm:$0xf]  ;;  %v1892_v43 = vld [vmem:[%s2384_s4 + $0x1c] sm:$0xf]  ;;  %v1897_v44 = vld [vmem:[%s2384_s4 + $0x20] sm:$0xf] }
  0x39   :  { %v1902_v45 = vld [vmem:[%s2384_s4 + $0x24] sm:$0xf]  ;;  %v1907_v46 = vld [vmem:[%s2384_s4 + $0x28] sm:$0xf]  ;;  %v1912_v47 = vld [vmem:[%s2384_s4 + $0x2c] sm:$0xf] }
  0x3a   :  { %v1917_v48 = vld [vmem:[%s2385_s5] ss:$0 sm:$0xff]  ;;  %v1266_v49 = vld [vmem:[%s2385_s5 + $0x1] ss:$8 sm:$0x3] }
  0x3b   :  { %v1925_v50 = vld [vmem:[%s2385_s5 + $0x2] ss:$0 sm:$0xff]  ;;  %v1927_v51 = vrot.slane %v1266_v49, %v106_v35  ;;  %v1929_v52 = vrot.slane %v1266_v49, %v110_v36  ;;  %v1934_v53 = vld [vmem:[%s2385_s5 + $0x3] ss:$0 sm:$0xff]  ;;  %v1939_v54 = vld [vmem:[%s2385_s5 + $0x4] ss:$0 sm:$0xff] }
  0x3c   :  { %2439 = vst [vmem:[#allocation42_spill] sm:$0xff] %v1934_v53  ;;  %2440 = vst [vmem:[#allocation43_spill] sm:$0xff] %v1939_v54  ;;  %v1944_v55 = vld [vmem:[%s2385_s5 + $0x5] ss:$0 sm:$0xff]  ;;  %v1949_v56 = vld [vmem:[%s2385_s5 + $0x6] ss:$0 sm:$0xff] }
  0x3d   :  { %2441 = vst [vmem:[#allocation44_spill] sm:$0xff] %v1944_v55  ;;  %v1954_v57 = vld [vmem:[%s2385_s5 + $0x7] ss:$0 sm:$0xff] }
  0x3e LB: > { %v2442_v1 = vld [vmem:[#allocation19_spill] sm:$0xff]  ;;  %v2443_v0 = vld [vmem:[#allocation18_spill] sm:$0xff]  ;;  %v1664_v61 = vmov 0.0   ;;  %v1271_v62 = vcombine.low %v1750_v4, %v1752_v5  ;;  %v187_v63 = vpack.c.bf16 %v1646_v59, %v1646_v59  ;;  %v2444_v3 = vld [vmem:[#allocation21_spill] sm:$0xff]  ;;  %vm1665_vm0 = vmmov 0   ;;  %s1267_s5 = sshll.u32 %s1650_s21, 2  ;;  %s1650_s21 = sphi %s1960_s21, %s125_s21   ;;  %v1646_v59 = vphi %v1958_v59, %v270_v59   ;;  %v1642_v58 = vphi %v1956_v58, %v264_v58  }
  0x3f   : > { %v1268_v60 = vcombine.low %v2443_v0, %v2442_v1  ;;  %1337 = vmatprep.subr.bf16.mxu1 %v1664_v61  ;;  %1345 = vmatprep.subr.bf16.mxu0 %v1664_v61  ;;  %v2445_v2 = vld [vmem:[#allocation20_spill] sm:$0xff]  ;;  %v1272_v22 = vcombine.low %v1754_v6, %v1756_v7  ;;  %s1666_s22 = smov 32   ;;  %s129_s23 = scalar_lea.vmem [#allocation6], %s1267_s5  ;;  %vm143_vm1 = vcmask 261120  }
  0x40   : > { %v1269_v9 = vcombine.low %v2445_v2, %v2444_v3  ;;  %1341 = vmatprep.mubr.msk.bf16.mxu1 %vm1665_vm0, %v1664_v61  ;;  %1346 = vmatpush3.bf16.msra.mxu0 %v1271_v62  ;;  %v130_v35 = vld [vmem:[%s129_s23] sm:$0xf]  ;;  %s1667_s24 = smov 64   ;;  %s1275_s1 = sshll.u32 %s1650_s21, 3 }
  0x41   : > { %1338 = vmatpush3.bf16.msra.mxu1 %v1268_v60  ;;  %189 = vrot.lane.b32.xlu0 %v187_v63, %s1666_s22  ;;  %s276_s25 = scalar_lea.vmem [#allocation2], %s1275_s1  ;;  %s125_s21 = sadd.s32 1, %s1650_s21  }
  0x42   : > { %1339 = vmatprep.subr.bf16.mxu1 %v1664_v61  ;;  %1347 = vmatprep.subr.bf16.mxu0 %v1664_v61  ;;  %p122_p2 = scmp.ge.s32.totalorder %s125_s21, 8  }
  0x43   : > { %1349 = vmatprep.mubr.msk.bf16.mxu0 %vm1665_vm0, %v1664_v61  ;;  %279 = vst.msk [vmem:[#allocation3] sm:$0xff] (%p122_p2), %vm143_vm1, %v1939_v54  ;;  %280 = vst.msk [vmem:[#allocation3 + $0x8] sm:$0xff] (%p122_p2), %vm143_vm1, %v1939_v54  ;;  %vm295_vm2 = vcmask (%p122_p2), 523264   ;;  %v2039_v4 = vmov (%p122_p2), 0.0   ;;  %s2041_s2 = smov (%p122_p2), 0  }
  0x44   : > { %1348 = vmatpush3.bf16.msra.mxu0 %v1272_v22  ;;  %281 = vst.msk [vmem:[#allocation3 + $0x10] sm:$0xff] (%p122_p2), %vm143_vm1, %v1939_v54  ;;  %282 = vst.msk [vmem:[#allocation3 + $0x18] sm:$0xff] (%p122_p2), %vm143_vm1, %v1939_v54 }
  0x45   : > { %1340 = vmatpush3.bf16.msra.mxu1 %v1269_v9  ;;  %283 = vst.msk [vmem:[#allocation3 + $0x20] sm:$0xff] (%p122_p2), %vm143_vm1, %v1939_v54  ;;  %284 = vst.msk [vmem:[#allocation3 + $0x28] sm:$0xff] (%p122_p2), %vm143_vm1, %v1939_v54 }
  0x46   :  { %285 = vst.msk [vmem:[#allocation3 + $0x30] sm:$0xff] (%p122_p2), %vm143_vm1, %v1939_v54  ;;  %286 = vst.msk [vmem:[#allocation3 + $0x38] sm:$0xff] (%p122_p2), %vm143_vm1, %v1939_v54 }
  0x47   :  { %287 = vst.msk [vmem:[#allocation4] sm:$0xff] (%p122_p2), %vm143_vm1, %v1944_v55  ;;  %288 = vst.msk [vmem:[#allocation4 + $0x8] sm:$0xff] (%p122_p2), %vm143_vm1, %v1944_v55 }
  0x48   : > { %1342 = vmatmul.mubr.msk.bf16.vlgmr.msra.gmra.mrb[0].mxu1 %vm143_vm1, %v130_v35  ;;  %289 = vst.msk [vmem:[#allocation4 + $0x10] sm:$0xff] (%p122_p2), %vm143_vm1, %v1944_v55  ;;  %290 = vst.msk [vmem:[#allocation4 + $0x18] sm:$0xff] (%p122_p2), %vm143_vm1, %v1944_v55 }
  0x49   :  { %291 = vst.msk [vmem:[#allocation4 + $0x20] sm:$0xff] (%p122_p2), %vm143_vm1, %v1944_v55  ;;  %292 = vst.msk [vmem:[#allocation4 + $0x28] sm:$0xff] (%p122_p2), %vm143_vm1, %v1944_v55 }
  0x4a   :  { %293 = vst.msk [vmem:[#allocation4 + $0x30] sm:$0xff] (%p122_p2), %vm143_vm1, %v1944_v55  ;;  %294 = vst.msk [vmem:[#allocation4 + $0x38] sm:$0xff] (%p122_p2), %vm143_vm1, %v1944_v55 }
  0x4b   :  { %296 = vst.msk [vmem:[#allocation5] sm:$0xff] (%p122_p2), %vm295_vm2, %v1949_v56  ;;  %297 = vst.msk [vmem:[#allocation5 + $0x8] sm:$0xff] (%p122_p2), %vm295_vm2, %v1949_v56 }
  0x4c   :  { %298 = vst.msk [vmem:[#allocation5 + $0x10] sm:$0xff] (%p122_p2), %vm295_vm2, %v1949_v56  ;;  %299 = vst.msk [vmem:[#allocation5 + $0x18] sm:$0xff] (%p122_p2), %vm295_vm2, %v1949_v56 }
  0x4d   :  { %300 = vst.msk [vmem:[#allocation5 + $0x20] sm:$0xff] (%p122_p2), %vm295_vm2, %v1949_v56  ;;  %301 = vst.msk [vmem:[#allocation5 + $0x28] sm:$0xff] (%p122_p2), %vm295_vm2, %v1949_v56 }
  0x4e   :  { %302 = vst.msk [vmem:[#allocation5 + $0x30] sm:$0xff] (%p122_p2), %vm295_vm2, %v1949_v56  ;;  %303 = vst.msk [vmem:[#allocation5 + $0x38] sm:$0xff] (%p122_p2), %vm295_vm2, %v1949_v56 }
  0xb3   : > { %v190_v36 = vpop.permute.xlu0 %189 }
  0xb4   : > { %1350 = vmatmul.mubr.msk.bf16.vlgmr.msra.gmra.mrb[0].mxu0 %vm143_vm1, %v190_v36 }
 0x11b   : > { %v181_v49 = vpop.f32.mrb[0].mxu1 }
 0x11c   : > { %v1343_v59 = vpop.f32.mrb[1].mxu1  ;;  %v182_v0 = vadd.f32 %v181_v49, %v1917_v48 }
 0x11d   : > { %v184_v60 = vpop.f32.mrb[2].mxu1 }
 0x11e   : > { %v1344_v62 = vpop.f32.mrb[3].mxu1 }
 0x187   : > { %v240_v1 = vpop.f32.mrb[0].mxu0 }
 0x188   : > { %v246_v63 = vadd.f32 %v240_v1, %v182_v0  ;;  %v1351_v2 = vpop.f32.mrb[1].mxu0 }
 0x189   : > { %v243_v61 = vpop.f32.mrb[2].mxu0 }
 0x18a   : > { %1474 = vtanh.f32 %v246_v63  ;;  %v1352_v9 = vpop.f32.mrb[3].mxu0  ;;  %v1274_v22 = vmul.f32 -1.442695, %v246_v63 }
 0x18c   : > { %1476 = vpow2.f32 %v1274_v22 }
 0x194   : > { %v1475_v3 = vpop.eup %1474 }
 0x195   : > { %256 = vrot.lane.b32.xlu0 %v1475_v3, %s1667_s24 }
 0x196   : > { %v1477_v35 = vpop.eup %1476 }
 0x197   : > { %v250_v36 = vadd.f32 1.0, %v1477_v35 }
 0x199   : > { %1478 = vrcp.f32 %v250_v36 }
 0x1a3   : > { %v1479_v59 = vpop.eup %1478 }
 0x1a4   : > { %v254_v49 = vmul.f32 %v1642_v58, %v1479_v59 }
 0x207   : > { %v257_v60 = vpop.permute.xlu0 %256 }
 0x208   : > { %v259_v62 = vmul.f32 %v1479_v59, %v257_v60 }
 0x20a   : > { %261 = vrot.lane.b32.xlu1 %v259_v62, %s1666_s22 }
 0x27c   : > { %v262_v0 = vpop.permute.xlu1 %261 }
 0x27d   : > { %v264_v58 = vadd.f32 %v262_v0, %v254_v49  }
 0x27f   : > { %1480 = vtanh.f32 %v264_v58 }
 0x289   : > { %v1481_v1 = vpop.eup %1480 }
 0x28a   : > { %267 = vrot.lane.b32.xlu1 %v1481_v1, %s1667_s24 }
 0x2fc   : > { %v268_v2 = vpop.permute.xlu1 %267 }
 0x2fd   : > { %v270_v59 = vmul.f32 %v1479_v59, %v268_v2  }
 0x2ff   : > { %272 = vrot.lane.b32.xlu0 %v270_v59, %s1666_s22 }
 0x36c   :  { %124 = sbr.rel (!%p122_p2) target bundleno = 62 (0x3e), region = 83 }
 0x371   : > { %v273_v3 = vpop.permute.xlu0 %272 }
 0x372   : > { %277 = vst.msk [vmem:[%s276_s25] sm:$0xff] %vm143_vm1, %v273_v3 }
 0x373 LB: > { %v2446_v20 = vld [vmem:[#allocation25_spill] sm:$0xff]  ;;  %v2447_v19 = vld [vmem:[#allocation24_spill] sm:$0xff]  ;;  %v2448_v18 = vld [vmem:[#allocation23_spill] sm:$0xff]  ;;  %v2388_v6 = vmov 0.0   ;;  %vm1669_vm3 = vmmov 0   ;;  %s2057_s26 = sshll.u32 %s1658_s2, 3  ;;  %s1041_s9 = scvt.s32.f32 %s1658_s2  ;;  %s1658_s2 = sphi %s2041_s2, %s309_s2   ;;  %v1654_v4 = vphi %v2039_v4, %v2247_v4  }
 0x374   : > { %v2449_v17 = vld [vmem:[#allocation22_spill] sm:$0xff]  ;;  %v2450_v33 = vld [vmem:[#allocation37_spill] sm:$0xff]  ;;  %v2451_v32 = vld [vmem:[#allocation36_spill] sm:$0xff]  ;;  %1353 = vmatprep.subr.bf16.mxu0 %v2388_v6  ;;  %1357 = vmatprep.mubr.msk.bf16.mxu0 %vm1669_vm3, %v2388_v6  ;;  %s312_s27 = scalar_lea.vmem [#allocation2], %s2057_s26  ;;  %v2390_v58 = vmov 0   ;;  %s631_s30 = scalar_lea.vmem %s2380_s0, %s2057_s26 }
 0x375   : > { %v2452_v31 = vld [vmem:[#allocation35_spill] sm:$0xff]  ;;  %v2453_v30 = vld [vmem:[#allocation34_spill] sm:$0xff]  ;;  %v2454_v29 = vld [vmem:[#allocation33_spill] sm:$0xff]  ;;  %1483 = vset.pattern.permute.xlu1 %v2390_v58  ;;  %1482 = vset.pattern.permute.xlu0 %v2390_v58  ;;  %p626_p3 = scmp.eq.s32.totalorder %s1658_s2, 0  ;;  %s1042_s10 = sadd.f32 1.0, %s1041_s9 }
 0x376   : > { %v2455_v28 = vld [vmem:[#allocation32_spill] sm:$0xff]  ;;  %v2456_v27 = vld [vmem:[#allocation31_spill] sm:$0xff]  ;;  %v2457_v26 = vld [vmem:[#allocation30_spill] sm:$0xff]  ;;  %422 = vmatprep.mubr.bf16.mxu1 %v2390_v58  ;;  %s1671_s11 = smov 64   ;;  %s1672_s4 = smov 96  }
 0x377   : > { %v2458_v25 = vld [vmem:[#allocation29_spill] sm:$0xff]  ;;  %v2459_v24 = vld [vmem:[#allocation28_spill] sm:$0xff]  ;;  %v2460_v23 = vld [vmem:[#allocation27_spill] sm:$0xff]  ;;  %s627_s8 = scalar_select %p626_p3, 1, 0 }
 0x378   : > { %v2461_v21 = vld [vmem:[#allocation26_spill] sm:$0xff]  ;;  %v2462_v37 = vld [vmem:[#allocation39_spill] sm:$0xff]  ;;  %v2464_v39 = vld [vmem:[#allocation41_spill] sm:$0xff]  ;;  %s1673_s13 = smov 32   ;;  %s980_s14 = scalar_lea.vmem [#allocation12], %s2057_s26 }
 0x379   : > { %v2463_v34 = vld [vmem:[#allocation38_spill] sm:$0xff]  ;;  %v2465_v38 = vld [vmem:[#allocation40_spill] sm:$0xff]  ;;  %v486_v59 = vld [vmem:[#allocation3 + $0x18] sm:$0xff]  ;;  %s1080_s15 = scalar_lea.vmem [#allocation11], %s2057_s26  ;;  %s1141_s3 = scalar_lea.vmem [#allocation3], %s2057_s26 }
 0x37a   : > { %v1277_v5 = vcombine.low %v2463_v34, %v2462_v37  ;;  %v1278_v7 = vcombine.low %v2465_v38, %v2464_v39  ;;  %v2061_v48 = vld [vmem:[%s312_s27] sm:$0xff]  ;;  %v485_v61 = vld [vmem:[#allocation3 + $0x10] sm:$0xff]  ;;  %v484_v60 = vld [vmem:[#allocation3 + $0x8] sm:$0xff]  ;;  %v1300_v39 = vcombine.high %v2447_v19, %v2446_v20  ;;  %s1195_s16 = scalar_lea.vmem [#allocation4], %s2057_s26 }
 0x37b   : > { %v2065_v56 = vpack.c.bf16 %v2061_v48, %v2061_v48  ;;  %v483_v9 = vld [vmem:[#allocation3] sm:$0xff]  ;;  %v2174_v34 = vld [vmem:[#allocation5 + $0x28] sm:$0xff]  ;;  %v494_v54 = vld [vmem:[#allocation4 + $0x18] sm:$0xff] }
 0x37c   : > { %1354 = vmatpush3.bf16.msra.mxu0 %v1277_v5  ;;  %v2466_v53 = vld [vmem:[#allocation42_spill] sm:$0xff] }
 0x37d   : > { %1355 = vmatprep.subr.bf16.mxu0 %v2388_v6 }
 0x380   : > { %1356 = vmatpush3.bf16.msra.mxu0 %v1278_v7  ;;  %v488_v7 = vld [vmem:[#allocation3 + $0x28] sm:$0xff] }
 0x381   : > { %1361 = vmatprep.subr.bf16.mxu0 %v2388_v6 }
 0x383   : > { %1358 = vmatmul.mubr.msk.bf16.vlgmr.msra.gmra.mrb[0].mxu0 %vm143_vm1, %v2065_v56 }
 0x384   : > { %1365 = vmatprep.mubr.msk.bf16.mxu0 %vm1669_vm3, %v2388_v6  ;;  %v487_v6 = vld [vmem:[#allocation3 + $0x20] sm:$0xff] }
 0x456   : > { %v364_v63 = vpop.f32.mrb[0].mxu0 }
 0x457   : > { %v365_v22 = vadd.f32 %v364_v63, %v2466_v53  ;;  %v1359_v35 = vpop.f32.mrb[1].mxu0 }
 0x458   : > { %v367_v36 = vpop.f32.mrb[2].mxu0 }
 0x459   : > { %v1360_v62 = vpop.f32.mrb[3].mxu0  ;;  %v501_v49 = vmul.f32 %v485_v61, %v365_v22  ;;  %v499_v0 = vmul.f32 %v483_v9, %v365_v22  ;;  %v502_v3 = vmul.f32 %v486_v59, %v365_v22  ;;  %v500_v5 = vmul.f32 %v484_v60, %v365_v22  ;;  %v490_v61 = vld [vmem:[#allocation3 + $0x38] sm:$0xff]  ;;  %v489_v9 = vld [vmem:[#allocation3 + $0x30] sm:$0xff] }
 0x45a   : > { %v504_v35 = vmul.f32 %v488_v7, %v365_v22  ;;  %v503_v36 = vmul.f32 %v487_v6, %v365_v22  ;;  %v506_v60 = vmul.f32 %v490_v61, %v365_v22  ;;  %v632_v6 = vld [vmem:[%s631_s30] sm:$0xff] }
 0x45b   : > { %v513_v1 = vsel %vm143_vm1, %v501_v49, 0.0  ;;  %v507_v2 = vsel %vm143_vm1, %v499_v0, 0.0  ;;  %v516_v58 = vsel %vm143_vm1, %v502_v3, 0.0  ;;  %v510_v63 = vsel %vm143_vm1, %v500_v5, 0.0 }
 0x45c   : > { %514 = vadd.xlane.f32.xlu1 %v513_v1  ;;  %508 = vadd.xlane.f32.xlu0 %v507_v2  ;;  %v522_v62 = vsel %vm143_vm1, %v504_v35, 0.0  ;;  %v519_v59 = vsel %vm143_vm1, %v503_v36, 0.0  ;;  %v505_v49 = vmul.f32 %v489_v9, %v365_v22  ;;  %v528_v0 = vsel %vm143_vm1, %v506_v60, 0.0 }
 0x45d   : > { %vm634_vm4 = vcmp.eq.s32.totalorder %v632_v6, 1  ;;  %vm635_vm5 = vcmp.eq.s32.totalorder %v632_v6, 2  ;;  %vm633_vm6 = vcmp.eq.s32.totalorder %v632_v6, 0  ;;  %vm636_vm7 = vcmp.eq.s32.totalorder %v632_v6, 3 }
 0x45e   : > { %v525_v1 = vsel %vm143_vm1, %v505_v49, 0.0  ;;  %vm637_vm8 = vcmp.eq.s32.totalorder %v632_v6, 4  ;;  %vm638_vm9 = vcmp.eq.s32.totalorder %v632_v6, 5  ;;  %v1281_v35 = vcombine.high %v2461_v21, %v2460_v23 }
 0x45f   : > { %vm639_vm10 = vcmp.eq.s32.totalorder %v632_v6, 6  ;;  %v1280_v36 = vcombine.low %v2461_v21, %v2460_v23  ;;  %v1283_v9 = vcombine.high %v2459_v24, %v2458_v25  ;;  %vm640_vm11 = vcmp.eq.s32.totalorder %v632_v6, 7 }
 0x460   : > { %517 = vadd.xlane.f32.xlu1 %v516_v58  ;;  %511 = vadd.xlane.f32.xlu0 %v510_v63  ;;  %v2467_v58 = vmov 0   ;;  %v1289_v60 = vcombine.high %v2457_v26, %v2456_v27  ;;  %v1288_v49 = vcombine.low %v2457_v26, %v2456_v27  ;;  %v1293_v6 = vcombine.high %v2453_v30, %v2452_v31 }
 0x461   : > { %v650_v2 = vsel %vm634_vm4, 1, %v2467_v58  ;;  %v651_v22 = vsel %vm635_vm5, 1, %v2467_v58  ;;  %v649_v3 = vsel %vm633_vm6, 1, %v2467_v58  ;;  %v652_v5 = vsel %vm636_vm7, 1, %v2467_v58  ;;  %390 = vmatprep.subr.bf16.mxu1 %v1281_v35 }
 0x462   : > { %v653_v7 = vsel %vm637_vm8, 1, %v2467_v58  ;;  %v654_v63 = vsel %vm638_vm9, 1, %v2467_v58  ;;  %391 = vmatpush1.bf16.msra.mxu1 %v1280_v36  ;;  %v655_v61 = vsel %vm639_vm10, 1, %v2467_v58 }
 0x463   : > { %392 = vmatprep.subr.bf16.mxu1 %v1283_v9 }
 0x464   : > { %523 = vadd.xlane.f32.xlu1 %v522_v62  ;;  %520 = vadd.xlane.f32.xlu0 %v519_v59  ;;  %v1282_v62 = vcombine.low %v2459_v24, %v2458_v25  ;;  %v656_v59 = vsel %vm640_vm11, 1, %v2467_v58 }
 0x466   : > { %393 = vmatpush1.bf16.msra.mxu1 %v1282_v62 }
 0x467   : > { %757 = vmatprep.subr.bf16.mxu1 %v1289_v60 }
 0x468   : > { %529 = vadd.xlane.f32.xlu1 %v528_v0  ;;  %526 = vadd.xlane.f32.xlu0 %v525_v1  ;;  %v1291_v0 = vcombine.high %v2455_v28, %v2454_v29  ;;  %v1290_v1 = vcombine.low %v2455_v28, %v2454_v29  ;;  %v2131_v29 = vld [vmem:[#allocation5 + $0x8] sm:$0xff] }
 0x469   : > { %1284 = vmatmul.mubr.msk.bf16.vlgmr.msra.gmra.mrb[0].mxu1 %vm143_vm1, %v2065_v56 }
 0x46a   : > { %758 = vmatpush1.bf16.msra.mxu1 %v1288_v49  ;;  %789 = vmatprep.mubr.bf16.mxu1 %v2467_v58 }
 0x46b   : > { %759 = vmatprep.subr.bf16.mxu1 %v1291_v0 }
 0x46e   : > { %760 = vmatpush1.bf16.msra.mxu1 %v1290_v1 }
 0x46f   : > { %761 = vmatprep.subr.bf16.mxu1 %v1293_v6 }
 0x479   : > { %661 = vperm.xlu1 %1483, %v650_v2   ;;  %v1292_v2 = vcombine.low %v2453_v30, %v2452_v31 }
 0x47b   : > { %762 = vmatpush1.bf16.msra.mxu1 %v1292_v2 }
 0x47d   : > { %664 = vperm.xlu1 %1483, %v651_v22   ;;  %v1295_v22 = vcombine.high %v2451_v32, %v2450_v33 }
 0x47e   : > { %658 = vperm.xlu0 %1482, %v649_v3   ;;  %v1294_v3 = vcombine.low %v2451_v32, %v2450_v33 }
 0x47f   : > { %763 = vmatprep.subr.bf16.mxu1 %v1295_v22 }
 0x480   : > { %764 = vmatpush1.bf16.msra.mxu1 %v1294_v3 }
 0x481   : > { %667 = vperm.xlu1 %1483, %v652_v5   ;;  %v1298_v5 = vcombine.high %v2449_v17, %v2448_v18 }
 0x483   : > { %821 = vmatprep.subr.bf16.mxu1 %v1298_v5 }
 0x485   : > { %670 = vperm.xlu1 %1483, %v653_v7  }
 0x489   : > { %673 = vperm.xlu1 %1483, %v654_v63  }
 0x48d   : > { %676 = vperm.xlu1 %1483, %v655_v61   ;;  %v539_v61 = vstv %s1658_s2  ;;  %s309_s2 = sadd.s32 1, %s1658_s2  }
 0x48e   : > { %vm540_vm12 = vcmp.ge.s32.totalorder %v539_v61, 0  ;;  %vm545_vm13 = vcmp.ge.s32.totalorder %v539_v61, 5  ;;  %vm544_vm14 = vcmp.ge.s32.totalorder %v539_v61, 4  ;;  %vm542_vm15 = vcmp.ge.s32.totalorder %v539_v61, 2  ;;  %p306_p4 = scmp.ge.s32.totalorder %s309_s2, 8  }
 0x48f   : > { %vm541_vm0 = vcmp.ge.s32.totalorder %v539_v61, 1  ;;  %vm543_vm4 = vcmp.ge.s32.totalorder %v539_v61, 3  ;;  %vm547_vm5 = vcmp.ge.s32.totalorder %v539_v61, 7  ;;  %vm546_vm6 = vcmp.ge.s32.totalorder %v539_v61, 6  ;;  %s1674_s17 = smov (%p306_p4), [#allocation11]  }
 0x490   :  { %s1202_s18 = sshll.u32 (%p306_p4), %s1674_s17, 4  ;;  %s1203_s18 = int_to_ptr.vmem [resolvable:$true] %s1202_s18 }
 0x491   : > { %679 = vperm.xlu1 %1483, %v656_v59   ;;  %s1568_s19 = scalar_lea.vmem (%p306_p4), %s1203_s18, 1024  ;;  %p1573_p6 = scmp.lt.s32.totalorder (%p306_p4), %s1203_s18, %s1203_s18 }
 0x492   :  { %p1569_p5 = scmp.ne.s32.totalorder (%p306_p4), %s1203_s18, %s1568_s19  ;;  %p1574_p7 = scmp.lt.s32.totalorder (%p306_p4), %s1568_s19, %s1568_s19 }
 0x494   :  { %p1575_p8 = por (%p306_p4), %p1574_p7, %p1573_p6 }
 0x496   :  { %p1576_p9 = pnand (%p306_p4), %p1575_p8, %p1569_p5 }
 0x4e9   : > { %v515_v7 = vpop.xlane.xlu1 %514  ;;  %v509_v63 = vpop.xlane.xlu0 %508 }
 0x4ea   : > { %v531_v9 = vmul.f32 0.17677669, %v509_v63  ;;  %v533_v1 = vmul.f32 0.17677669, %v515_v7 }
 0x4ec   : > { %v548_v3 = vsel %vm540_vm12, %v531_v9, -1e+09  ;;  %v550_v25 = vsel %vm542_vm15, %v533_v1, -1e+09 }
 0x4ed   : > { %v518_v35 = vpop.xlane.xlu1 %517  ;;  %v512_v36 = vpop.xlane.xlu0 %511 }
 0x4ee   : > { %v532_v60 = vmul.f32 0.17677669, %v512_v36  ;;  %v534_v6 = vmul.f32 0.17677669, %v518_v35 }
 0x4f0   : > { %v549_v21 = vsel %vm541_vm0, %v532_v60, -1e+09 }
 0x4f1   : > { %v524_v62 = vpop.xlane.xlu1 %523  ;;  %v521_v59 = vpop.xlane.xlu0 %520 }
 0x4f2   : > { %v536_v49 = vmul.f32 0.17677669, %v524_v62  ;;  %v535_v0 = vmul.f32 0.17677669, %v521_v59  ;;  %v551_v59 = vsel %vm543_vm4, %v534_v6, -1e+09 }
 0x4f4   : > { %v2126_v2 = vsel %vm545_vm13, %v536_v49, -1e+09  ;;  %v552_v22 = vsel %vm544_vm14, %v535_v0, -1e+09 }
 0x4f5   : > { %v530_v5 = vpop.xlane.xlu1 %529  ;;  %v527_v63 = vpop.xlane.xlu0 %526  ;;  %v557_v36 = vmax.f32 %v549_v21, %v2126_v2  ;;  %v556_v62 = vmax.f32 %v548_v3, %v552_v22 }
 0x4f6   : > { %v538_v23 = vmul.f32 0.17677669, %v530_v5  ;;  %v537_v24 = vmul.f32 0.17677669, %v527_v63  ;;  %v2141_v63 = vld [vmem:[#allocation5 + $0x10] sm:$0xff] }
 0x4f7   : > { %v560_v9 = vmax.f32 %v556_v62, %v557_v36 }
 0x4f8   : > { %v555_v7 = vsel %vm547_vm5, %v538_v23, -1e+09  ;;  %v554_v26 = vsel %vm546_vm6, %v537_v24, -1e+09 }
 0x4f9   : > { %v559_v35 = vmax.f32 %v551_v59, %v555_v7  ;;  %v558_v49 = vmax.f32 %v550_v25, %v554_v26  ;;  %v2129_v27 = vpop.permute.xlu1 %661 }
 0x4fa   : > { %2468 = vst [vmem:[#allocation45_spill] sm:$0xff] %v2129_v27  ;;  %vm682_vm7 = vcmp.eq.s32.totalorder %v2129_v27, 1 }
 0x4fb   : > { %v561_v0 = vmax.f32 %v558_v49, %v559_v35  ;;  %v690_v24 = vsel %vm682_vm7, %v2131_v29, 0.0  ;;  %v2146_v49 = vld [vmem:[#allocation5] sm:$0xff] }
 0x4fd   : > { %v562_v28 = vmax.f32 %v560_v9, %v561_v0  ;;  %v2134_v61 = vpop.permute.xlu1 %664  ;;  %v2136_v60 = vpop.permute.xlu0 %658  ;;  %v698_v9 = vsel %vm295_vm2, %v690_v24, 0.0 }
 0x4fe   : > { %vm683_vm8 = vcmp.eq.s32.totalorder %v2134_v61, 1  ;;  %vm681_vm9 = vcmp.eq.s32.totalorder %v2136_v60, 1 }
 0x4ff   : > { %v563_v1 = vsub.f32 %v548_v3, %v562_v28  ;;  %v564_v5 = vsub.f32 %v549_v21, %v562_v28  ;;  %v565_v6 = vsub.f32 %v550_v25, %v562_v28  ;;  %v566_v23 = vsub.f32 %v551_v59, %v562_v28  ;;  %v2149_v25 = vld [vmem:[#allocation5 + $0x18] sm:$0xff] }
 0x500   : > { %v567_v3 = vsub.f32 %v552_v22, %v562_v28  ;;  %v568_v59 = vsub.f32 %v2126_v2, %v562_v28  ;;  %v691_v0 = vsel %vm683_vm8, %v2141_v63, 0.0  ;;  %v689_v22 = vsel %vm681_vm9, %v2146_v49, 0.0 }
 0x501   : > { %v571_v36 = vmul.f32 1.442695, %v563_v1  ;;  %v573_v62 = vmul.f32 1.442695, %v564_v5  ;;  %v2144_v35 = vpop.permute.xlu1 %667  ;;  %v575_v21 = vmul.f32 1.442695, %v565_v6  ;;  %v569_v6 = vsub.f32 %v554_v26, %v562_v28 }
 0x502   : > { %2469 = vst [vmem:[#allocation46_spill] sm:$0xff] %v2144_v35  ;;  %v577_v1 = vmul.f32 1.442695, %v566_v23  ;;  %vm684_vm10 = vcmp.eq.s32.totalorder %v2144_v35, 1  ;;  %v2157_v5 = vld [vmem:[#allocation5 + $0x20] sm:$0xff]  ;;  %v700_v2 = vsel %vm295_vm2, %v691_v0, 0.0  ;;  %v570_v0 = vsub.f32 %v555_v7, %v562_v28 }
 0x503   : > { %1484 = vpow2.f32 %v571_v36  ;;  %v692_v24 = vsel %vm684_vm10, %v2149_v25, 0.0  ;;  %v579_v23 = vmul.f32 1.442695, %v567_v3  ;;  %v581_v32 = vmul.f32 1.442695, %v568_v59  ;;  %v2184_v59 = vld [vmem:[#allocation5 + $0x30] sm:$0xff] }
 0x504   : > { %1486 = vpow2.f32 %v573_v62  ;;  %v697_v62 = vsel %vm295_vm2, %v689_v22, 0.0  ;;  %v702_v31 = vsel %vm295_vm2, %v692_v24, 0.0  ;;  %v583_v3 = vmul.f32 1.442695, %v569_v6  ;;  %v496_v35 = vld [vmem:[#allocation4 + $0x28] sm:$0xff] }
 0x505   : > { %v2166_v36 = vpop.permute.xlu1 %670  ;;  %1488 = vpow2.f32 %v575_v21  ;;  %v699_v30 = vadd.f32 %v698_v9, %v697_v62  ;;  %v585_v28 = vmul.f32 1.442695, %v570_v0  ;;  %v2193_v62 = vld [vmem:[#allocation5 + $0x38] sm:$0xff] }
 0x506   : > { %vm685_vm11 = vcmp.eq.s32.totalorder %v2166_v36, 1  ;;  %1490 = vpow2.f32 %v577_v1  ;;  %2471 = vst [vmem:[#allocation48_spill] sm:$0xff] %v2193_v62 }
 0x507   : > { %v693_v26 = vsel %vm685_vm11, %v2157_v5, 0.0  ;;  %v701_v33 = vadd.f32 %v700_v2, %v699_v30  ;;  %1492 = vpow2.f32 %v579_v23 }
 0x508   : > { %v704_v37 = vsel %vm295_vm2, %v693_v26, 0.0  ;;  %1494 = vpow2.f32 %v581_v32 }
 0x509   : > { %v2177_v22 = vpop.permute.xlu1 %673  ;;  %v703_v21 = vadd.f32 %v702_v31, %v701_v33  ;;  %1496 = vpow2.f32 %v583_v3 }
 0x50a   : > { %2470 = vst [vmem:[#allocation47_spill] sm:$0xff] %v2177_v22  ;;  %vm686_vm12 = vcmp.eq.s32.totalorder %v2177_v22, 1  ;;  %1498 = vpow2.f32 %v585_v28 }
 0x50b   : > { %v694_v9 = vsel %vm686_vm12, %v2174_v34, 0.0  ;;  %v705_v7 = vadd.f32 %v704_v37, %v703_v21 }
 0x50c   : > { %v706_v30 = vsel %vm295_vm2, %v694_v9, 0.0 }
 0x50d   : > { %v1485_v1 = vpop.eup %1484  ;;  %v2186_v2 = vpop.permute.xlu1 %676  ;;  %v707_v6 = vadd.f32 %v706_v30, %v705_v7  ;;  %v2474_v61 = vld [vmem:[#allocation48_spill] sm:$0xff] }
 0x50e   : > { %v1487_v24 = vpop.eup %1486  ;;  %vm687_vm13 = vcmp.eq.s32.totalorder %v2186_v2, 1 }
 0x50f   : > { %v587_v31 = vadd.f32 %v1487_v24, %v1485_v1  ;;  %v695_v33 = vsel %vm687_vm13, %v2184_v59, 0.0  ;;  %v1489_v32 = vpop.eup %1488 }
 0x510   : > { %v708_v37 = vsel %vm295_vm2, %v695_v33, 0.0  ;;  %v1491_v21 = vpop.eup %1490 }
 0x511   : > { %v588_v23 = vadd.f32 %v1489_v32, %v587_v31  ;;  %v709_v26 = vadd.f32 %v708_v37, %v707_v6  ;;  %v2195_v0 = vpop.permute.xlu1 %679  ;;  %v1493_v7 = vpop.eup %1492  ;;  %v1297_v31 = vcombine.low %v2449_v17, %v2448_v18  ;;  %v493_v17 = vld [vmem:[#allocation4 + $0x10] sm:$0xff] }
 0x512   : > { %2472 = vst [vmem:[#allocation49_spill] sm:$0xff] %v2195_v0  ;;  %vm688_vm14 = vcmp.eq.s32.totalorder %v2195_v0, 1  ;;  %v1495_v33 = vpop.eup %1494 }
 0x513   : > { %v589_v3 = vadd.f32 %v1491_v21, %v588_v23  ;;  %v696_v9 = vsel %vm688_vm14, %v2193_v62, 0.0  ;;  %v1497_v53 = vpop.eup %1496 }
 0x514   : > { %v710_v30 = vsel %vm295_vm2, %v696_v9, 0.0  ;;  %v1499_v55 = vpop.eup %1498  ;;  %v1299_v9 = vcombine.low %v2447_v19, %v2446_v20 }
 0x515   : > { %v590_v28 = vadd.f32 %v1493_v7, %v589_v3  ;;  %v711_v38 = vadd.f32 %v710_v30, %v709_v26  ;;  %v2473_v3 = vmov 0.0   ;;  %v491_v30 = vld [vmem:[#allocation4] sm:$0xff] }
 0x517   : > { %v591_v6 = vadd.f32 %v1495_v33, %v590_v28  ;;  %v713_v37 = vpack.c.bf16 %v711_v38, %v711_v38  ;;  %v492_v28 = vld [vmem:[#allocation4 + $0x8] sm:$0xff] }
 0x519   : > { %v592_v23 = vadd.f32 %v1497_v53, %v591_v6  ;;  %1296 = vmatmul.mubr.msk.bf16.vlgmr.msra.gmra.mrb[0].mxu1 %vm295_vm2, %v713_v37 }
 0x51a   : > { %822 = vmatpush1.bf16.msra.mxu1 %v1297_v31  ;;  %853 = vmatprep.mubr.bf16.mxu1 %v2467_v58 }
 0x51b   : > { %v593_v26 = vadd.f32 %v1499_v55, %v592_v23  ;;  %823 = vmatprep.subr.bf16.mxu1 %v1300_v39  ;;  %v495_v23 = vld [vmem:[#allocation4 + $0x20] sm:$0xff] }
 0x51d   : > { %1500 = vrcp.f32 %v593_v26 }
 0x51e   : > { %824 = vmatpush1.bf16.msra.mxu1 %v1299_v9 }
 0x51f   : > { %1389 = vmatprep.subr.bf16.mxu1 %v2473_v3 }
 0x527   : > { %v1501_v38 = vpop.eup %1500 }
 0x528   : > { %v595_v6 = vmul.f32 %v1501_v38, %v1485_v1  ;;  %v596_v37 = vmul.f32 %v1501_v38, %v1487_v24  ;;  %v597_v18 = vmul.f32 %v1501_v38, %v1489_v32  ;;  %v598_v31 = vmul.f32 %v1501_v38, %v1491_v21  ;;  %v497_v32 = vld [vmem:[#allocation4 + $0x30] sm:$0xff] }
 0x529   : > { %v599_v0 = vmul.f32 %v1501_v38, %v1493_v7  ;;  %v600_v39 = vmul.f32 %v1501_v38, %v1495_v33  ;;  %v601_v1 = vmul.f32 %v1501_v38, %v1497_v53  ;;  %v602_v7 = vmul.f32 %v1501_v38, %v1499_v55 }
 0x52a   : > { %v603_v19 = vmul.f32 %v595_v6, %v491_v30  ;;  %v604_v20 = vmul.f32 %v596_v37, %v492_v28  ;;  %v605_v58 = vmul.f32 %v597_v18, %v493_v17  ;;  %v606_v26 = vmul.f32 %v598_v31, %v494_v54  ;;  %v498_v18 = vld [vmem:[#allocation4 + $0x38] sm:$0xff] }
 0x52b   : > { %v607_v62 = vmul.f32 %v599_v0, %v495_v23  ;;  %v608_v30 = vmul.f32 %v600_v39, %v496_v35  ;;  %v609_v54 = vmul.f32 %v601_v1, %v497_v32  ;;  %v628_v28 = vstv %s627_s8 }
 0x52c   : > { %v611_v9 = vsel %vm143_vm1, %v603_v19, 0.0  ;;  %v612_v22 = vsel %vm143_vm1, %v604_v20, 0.0  ;;  %v614_v24 = vsel %vm143_vm1, %v605_v58, 0.0  ;;  %v616_v17 = vsel %vm143_vm1, %v606_v26, 0.0 }
 0x52d   : > { %v613_v27 = vadd.f32 %v612_v22, %v611_v9  ;;  %v618_v19 = vsel %vm143_vm1, %v607_v62, 0.0  ;;  %v610_v22 = vmul.f32 %v602_v7, %v498_v18  ;;  %v620_v53 = vsel %vm143_vm1, %v608_v30, 0.0 }
 0x52e   : > { %v622_v6 = vsel %vm143_vm1, %v609_v54, 0.0  ;;  %vm629_vm15 = vcmp.eq.s32.totalorder %v628_v28, 1  ;;  %v1043_v62 = vstv %s1042_s10  ;;  %v1285_v18 = vcombine.low %v1766_v13, %v1768_v14 }
 0x52f   : > { %v615_v21 = vadd.f32 %v614_v24, %v613_v27  ;;  %v624_v55 = vsel %vm143_vm1, %v610_v22, 0.0  ;;  %1502 = vrcp.f32 %v1043_v62  ;;  %v1304_v54 = vcombine.low %v1758_v8, %v1760_v10 }
 0x530   : > { %1362 = vmatpush3.bf16.msra.mxu0 %v1285_v18 }
 0x531   : > { %v617_v33 = vadd.f32 %v616_v17, %v615_v21  ;;  %1363 = vmatprep.subr.bf16.mxu0 %v2473_v3 }
 0x533   : > { %v619_v20 = vadd.f32 %v618_v19, %v617_v33  ;;  %v1286_v33 = vcombine.low %v1770_v15, %v1772_v16  ;;  %v1305_v19 = vcombine.low %v1762_v11, %v1764_v12 }
 0x535   : > { %v621_v0 = vadd.f32 %v620_v53, %v619_v20  ;;  %1364 = vmatpush3.bf16.msra.mxu0 %v1286_v33 }
 0x536   : > { %1369 = vmatprep.subr.bf16.mxu0 %v2473_v3 }
 0x537   : > { %v623_v27 = vadd.f32 %v622_v6, %v621_v0 }
 0x538   : > { %1366 = vmatmul.mubr.msk.bf16.vlgmr.msra.gmra.mrb[4].mxu0 %vm143_vm1, %v2065_v56 }
 0x539   : > { %v625_v35 = vadd.f32 %v624_v55, %v623_v27  ;;  %v1503_v31 = vpop.eup %1502  ;;  %1370 = vmatpush3.bf16.msra.mxu0 %v1304_v54  ;;  %1377 = vmatprep.mubr.msk.bf16.mxu0 %vm1669_vm3, %v2473_v3 }
 0x53a   : > { %1414 = vpush %v1503_v31  ;;  %1371 = vmatprep.subr.bf16.mxu0 %v2473_v3 }
 0x53b   : > { %v630_v38 = vsel %vm629_vm15, %v1954_v57, %v625_v35 }
 0x53c   : > { %v712_v37 = vpack.c.bf16 %v630_v38, %v630_v38 }
 0x53d   : > { %1372 = vmatpush3.bf16.msra.mxu0 %v1305_v19  ;;  %v1308_v19 = vcombine.low %v1877_v40, %v1882_v41 }
 0x53e   : > { %1301 = vmatmul.mubr.msk.bf16.vlgmr.msra.gmra.mrb[0].mxu1 %vm143_vm1, %v712_v37  ;;  %1373 = vmatprep.subr.bf16.mxu0 %v2473_v3 }
 0x53f   : > { %1393 = vmatprep.mubr.msk.bf16.mxu1 %vm1669_vm3, %v2473_v3 }
 0x541   : > { %1374 = vmatpush3.bf16.msra.mxu0 %v1285_v18 }
 0x542   : > { %1375 = vmatprep.subr.bf16.mxu0 %v2473_v3 }
 0x545   : > { %1376 = vmatpush3.bf16.msra.mxu0 %v1286_v33 }
 0x546   : > { %1381 = vmatprep.subr.bf16.mxu0 %v2473_v3 }
 0x56b   : > { %s1415_s12 = spop %1414 }
 0x56c   : > { %v1046_v35 = vstv %s1415_s12 }
 0x611   : > { %v855_v58 = vpop.f32.mrb[0].mxu1 }
 0x612   : > { %v1399_v23 = vadd.f32 %v855_v58, %v1927_v51  ;;  %v857_v39 = vpop.f32.mrb[1].mxu1 }
 0x613   : > { %v859_v26 = vpop.f32.mrb[2].mxu1  ;;  %v1400_v24 = vadd.f32 %v857_v39, %v1929_v52 }
 0x614   : > { %v1302_v9 = vmul.f32 -1.442695, %v1399_v23  ;;  %v860_v1 = vpop.f32.mrb[3].mxu1 }
 0x615   : > { %v1303_v20 = vmul.f32 -1.442695, %v1400_v24 }
 0x616   : > { %1504 = vpow2.f32 %v1302_v9 }
 0x617   : > { %1506 = vtanh.f32 %v1400_v24 }
 0x620   : > { %v1505_v32 = vpop.eup %1504 }
 0x621   : > { %v867_v21 = vadd.f32 1.0, %v1505_v32  ;;  %v1507_v7 = vpop.eup %1506 }
 0x623   : > { %1508 = vrcp.f32 %v867_v21 }
 0x624   : > { %1510 = vpow2.f32 %v1303_v20  ;;  %v1311_v20 = vcombine.low %v1897_v44, %v1902_v45 }
 0x626   : > { %1390 = vmatpush3.bf16.msra.mxu1 %v1311_v20 }
 0x627   : > { %1391 = vmatprep.subr.bf16.mxu1 %v2473_v3 }
 0x62d   : > { %v1509_v30 = vpop.eup %1508 }
 0x62e   : > { %v878_v17 = vmul.f32 %v1509_v30, %v1507_v7  ;;  %v1511_v56 = vpop.eup %1510  ;;  %v877_v53 = vmul.f32 %v1654_v4, %v1509_v30 }
 0x62f   : > { %v874_v22 = vadd.f32 1.0, %v1511_v56  ;;  %v1309_v56 = vcombine.low %v1887_v42, %v1892_v43 }
 0x630   : > { %880 = vrot.lane.b32.xlu1 %v878_v17, %s1671_s11 }
 0x631   : > { %1512 = vrcp.f32 %v874_v22 }
 0x63b   : > { %v1513_v28 = vpop.eup %1512 }
 0x6a2   : > { %v881_v0 = vpop.permute.xlu1 %880 }
 0x6a3   : > { %v2247_v4 = vadd.f32 %v881_v0, %v877_v53  }
 0x6a5   : > { %1514 = vtanh.f32 %v2247_v4  ;;  %v1047_v38 = vmul.f32 %v1046_v35, %v2247_v4 }
 0x6af   : > { %v1515_v6 = vpop.eup %1514 }
 0x6b0   : > { %v2250_v27 = vmul.f32 %v1515_v6, %v1513_v28 }
 0x6b2   : > { %v982_v55 = vpack.c.bf16 %v2250_v27, %v2250_v27 }
 0x6b4   : > { %984 = vrot.lane.b32.xlu0 %v982_v55, %s1671_s11 }
 0x6b8   : > { %1056 = vrot.lane.b32.xlu0 %v1047_v38, %s1672_s4 }
 0x726   : > { %v985_v37 = vpop.permute.xlu0 %984 }
 0x727   : > { %1378 = vmatmul.mubr.msk.bf16.vlgmr.msra.gmra.mrb[4].mxu0 %vm295_vm2, %v985_v37 }
 0x728   : > { %1385 = vmatprep.mubr.msk.bf16.mxu0 %vm1669_vm3, %v2473_v3  ;;  %1382 = vmatpush3.bf16.msra.mxu0 %v1308_v19 }
 0x729   : > { %1383 = vmatprep.subr.bf16.mxu0 %v2473_v3 }
 0x72a   : > { %v1057_v30 = vpop.permute.xlu0 %1056 }
 0x72c   : > { %1384 = vmatpush3.bf16.msra.mxu0 %v1309_v56  ;;  %v2479_v56 = vld [vmem:[#allocation43_spill] sm:$0xff] }
 0x7fa   : > { %v1035_v62 = vpop.f32.mrb[4].mxu0 }
 0x7fb   : > { %v1401_v31 = vadd.f32 %v1035_v62, %v1925_v50  ;;  %v1379_v58 = vpop.f32.mrb[5].mxu0 }
 0x7fc   : > { %v1038_v23 = vpop.f32.mrb[6].mxu0 }
 0x7fd   : > { %1516 = vtanh.f32 %v1401_v31  ;;  %v1380_v39 = vpop.f32.mrb[7].mxu0  ;;  %v1307_v9 = vmul.f32 -1.442695, %v1401_v31 }
 0x7ff   : > { %1518 = vpow2.f32 %v1307_v9 }
 0x807   : > { %v1517_v26 = vpop.eup %1516 }
 0x808   : > { %1061 = vrot.lane.b32.xlu1 %v1517_v26, %s1671_s11 }
 0x809   : > { %v1519_v1 = vpop.eup %1518 }
 0x80a   : > { %v1051_v24 = vadd.f32 1.0, %v1519_v1 }
 0x80c   : > { %1520 = vrcp.f32 %v1051_v24 }
 0x816   : > { %v1521_v32 = vpop.eup %1520 }
 0x817   : > { %v1059_v17 = vmul.f32 %v1521_v32, %v1057_v30 }
 0x87a   : > { %v1062_v21 = vpop.permute.xlu1 %1061 }
 0x87b   : > { %v1064_v7 = vmul.f32 %v1521_v32, %v1062_v21 }
 0x87d   : > { %1066 = vrot.lane.b32.xlu1 %v1064_v7, %s1673_s13 }
 0x8ef   : > { %v1067_v18 = vpop.permute.xlu1 %1066 }
 0x8f0   : > { %v1069_v33 = vadd.f32 %v1067_v18, %v1059_v17 }
 0x8f2   : > { %1522 = vtanh.f32 %v1069_v33 }
 0x8fc   : > { %v1523_v54 = vpop.eup %1522 }
 0x8fd   : > { %1072 = vrot.lane.b32.xlu0 %v1523_v54, %s1671_s11 }
 0x901   : > { %967 = vrot.lane.b32.xlu0 %v2061_v48, %s1673_s13  ;;  %v1312_v48 = vcombine.low %v1907_v46, %v1912_v47 }
 0x903   : > { %1392 = vmatpush3.bf16.msra.mxu1 %v1312_v48 }
 0x905   : > { %894 = vrot.lane.b32.xlu0 %v2146_v49, %s1671_s11 }
 0x909   : > { %898 = vrot.lane.b32.xlu0 %v2141_v63, %s1671_s11 }
 0x90d   : > { %902 = vrot.lane.b32.xlu0 %v2157_v5, %s1671_s11 }
 0x911   : > { %906 = vrot.lane.b32.xlu0 %v2184_v59, %s1671_s11 }
 0x96f   : > { %v1073_v63 = vpop.permute.xlu0 %1072 }
 0x970   : > { %v1075_v49 = vmul.f32 %v1521_v32, %v1073_v63  ;;  %v2480_v63 = vld [vmem:[#allocation44_spill] sm:$0xff] }
 0x972   : > { %v1082_v22 = vpack.c.bf16 %v1075_v49, %v1075_v49 }
 0x973   : > { %v968_v53 = vpop.permute.xlu0 %967 }
 0x974   : > { %1084 = vrot.lane.b32.xlu1 %v1082_v22, %s1673_s13  ;;  %v970_v0 = vsel %vm143_vm1, %v1954_v57, %v968_v53 }
 0x977   : > { %v895_v28 = vpop.permute.xlu0 %894 }
 0x978   : > { %972 = vrot.lane.b32.xlu1 %v970_v0, %s1671_s11  ;;  %v918_v5 = vsel %vm681_vm9, %v2250_v27, %v895_v28 }
 0x979   : > { %934 = vrot.lane.b32.xlu0 %v918_v5, %s1671_s11 }
 0x97b   : > { %v899_v3 = vpop.permute.xlu0 %898 }
 0x97c   : > { %896 = vrot.lane.b32.xlu1 %v2131_v29, %s1671_s11  ;;  %v920_v59 = vsel %vm683_vm8, %v2250_v27, %v899_v3 }
 0x97d   : > { %938 = vrot.lane.b32.xlu0 %v920_v59, %s1671_s11 }
 0x97f   : > { %v903_v6 = vpop.permute.xlu0 %902 }
 0x980   : > { %900 = vrot.lane.b32.xlu1 %v2149_v25, %s1671_s11  ;;  %v922_v60 = vsel %vm685_vm11, %v2250_v27, %v903_v6 }
 0x981   : > { %942 = vrot.lane.b32.xlu0 %v922_v60, %s1671_s11 }
 0x983   : > { %v907_v55 = vpop.permute.xlu0 %906 }
 0x984   : > { %904 = vrot.lane.b32.xlu1 %v2174_v34, %s1671_s11  ;;  %v924_v29 = vsel %vm687_vm13, %v2250_v27, %v907_v55 }
 0x985   : > { %946 = vrot.lane.b32.xlu0 %v924_v29, %s1671_s11 }
 0x988   : > { %908 = vrot.lane.b32.xlu1 %v2474_v61, %s1671_s11 }
 0x9e6   : > { %v1085_v25 = vpop.permute.xlu1 %1084 }
 0x9e7   : > { %1386 = vmatmul.mubr.msk.bf16.vlgmr.msra.gmra.mrb[8].mxu0 %vm143_vm1, %v1085_v25  ;;  %1394 = vmatmul.mubr.msk.bf16.vlgmr.msra.gmra.mrb[4].mxu1 %vm143_vm1, %v1085_v25 }
 0x9ea   : > { %v973_v36 = vpop.permute.xlu1 %972 }
 0x9eb   : > { %v975_v35 = vadd.f32 %v973_v36, %v2250_v27  ;;  %v935_v38 = vpop.permute.xlu0 %934 }
 0x9ec   : > { %958 = vst.msk [vmem:[#allocation5] sm:$0xff] %vm295_vm2, %v935_v38 }
 0x9ed   : > { %977 = vrot.lane.b32.xlu0 %v975_v35, %s1671_s11 }
 0x9ee   : > { %v897_v34 = vpop.permute.xlu1 %896 }
 0x9ef   : > { %v939_v2 = vpop.permute.xlu0 %938  ;;  %v919_v62 = vsel %vm682_vm7, %v2250_v27, %v897_v34 }
 0x9f0   : > { %960 = vst.msk [vmem:[#allocation5 + $0x10] sm:$0xff] %vm295_vm2, %v939_v2  ;;  %936 = vrot.lane.b32.xlu1 %v919_v62, %s1671_s11 }
 0x9f2   : > { %v901_v31 = vpop.permute.xlu1 %900 }
 0x9f3   : > { %v943_v58 = vpop.permute.xlu0 %942  ;;  %v921_v39 = vsel %vm684_vm10, %v2250_v27, %v901_v31 }
 0x9f4   : > { %962 = vst.msk [vmem:[#allocation5 + $0x20] sm:$0xff] %vm295_vm2, %v943_v58  ;;  %940 = vrot.lane.b32.xlu1 %v921_v39, %s1671_s11 }
 0x9f6   : > { %v905_v26 = vpop.permute.xlu1 %904 }
 0x9f7   : > { %v947_v9 = vpop.permute.xlu0 %946  ;;  %v923_v24 = vsel %vm686_vm12, %v2250_v27, %v905_v26 }
 0x9f8   : > { %964 = vst.msk [vmem:[#allocation5 + $0x30] sm:$0xff] %vm295_vm2, %v947_v9  ;;  %944 = vrot.lane.b32.xlu1 %v923_v24, %s1671_s11 }
 0x9fa   : > { %v909_v32 = vpop.permute.xlu1 %908 }
 0x9fb   : > { %v925_v7 = vsel %vm688_vm14, %v2250_v27, %v909_v32 }
 0x9fc   : > { %948 = vrot.lane.b32.xlu1 %v925_v7, %s1671_s11 }
 0xa00   : > { %1077 = vrot.lane.b32.xlu1 %v1075_v49, %s1673_s13 }
 0xa5f   : > { %v978_v30 = vpop.permute.xlu0 %977 }
 0xa60   : > { %981 = vst.msk [vmem:[%s980_s14] sm:$0xff] %vm295_vm2, %v978_v30 }
 0xa62   : > { %v937_v17 = vpop.permute.xlu1 %936 }
 0xa63   : > { %959 = vst.msk [vmem:[#allocation5 + $0x8] sm:$0xff] %vm295_vm2, %v937_v17 }
 0xa66   : > { %v941_v18 = vpop.permute.xlu1 %940 }
 0xa67   : > { %961 = vst.msk [vmem:[#allocation5 + $0x18] sm:$0xff] %vm295_vm2, %v941_v18 }
 0xa6a   : > { %v945_v33 = vpop.permute.xlu1 %944 }
 0xa6b   : > { %963 = vst.msk [vmem:[#allocation5 + $0x28] sm:$0xff] %vm295_vm2, %v945_v33 }
 0xa6e   : > { %v949_v27 = vpop.permute.xlu1 %948 }
 0xa6f   : > { %965 = vst.msk [vmem:[#allocation5 + $0x38] sm:$0xff] %vm295_vm2, %v949_v27 }
 0xa72   : > { %v1078_v54 = vpop.permute.xlu1 %1077 }
 0xa73   : > { %1081 = vst.msk [vmem:[%s1080_s15] sm:$0xff] %vm143_vm1, %v1078_v54 }
 0xab7   :  { %308 = sbr.rel (!%p306_p4) target bundleno = 883 (0x373), region = 94 }
 0xaba   : > { %v1135_v19 = vpop.f32.mrb[8].mxu0  ;;  %v1189_v20 = vpop.f32.mrb[4].mxu1 }
 0xabb   : > { %v1136_v48 = vadd.f32 %v1135_v19, %v2479_v56  ;;  %v1190_v49 = vadd.f32 %v1189_v20, %v2480_v63  ;;  %v1387_v22 = vpop.f32.mrb[9].mxu0  ;;  %v1395_v53 = vpop.f32.mrb[5].mxu1 }
 0xabc   : > { %v1138_v0 = vpop.f32.mrb[10].mxu0  ;;  %v1192_v28 = vpop.f32.mrb[6].mxu1 }
 0xabd   : > { %1142 = vst.msk [vmem:[%s1141_s3] sm:$0xff] %vm143_vm1, %v1136_v48  ;;  %1196 = vst.msk [vmem:[%s1195_s16] sm:$0xff] %vm143_vm1, %v1190_v49  ;;  %v1388_v5 = vpop.f32.mrb[11].mxu0  ;;  %v1396_v3 = vpop.f32.mrb[7].mxu1 }
 0xabe   :  { %1579 = shalt.err (!%p1576_p9)
}
 0xabf   :  { %s1580_s5 = scalar_lea.hbm %s2386_s6, 1024 }
 0xac0   :  { %p1581_p10 = scmp.ne.s32.totalorder %s2386_s6, %s1580_s5  ;;  %p1584_p11 = scmp.lt.u32.totalorder %s1580_s5, %s2386_s6 }
 0xac2   :  { %p1586_p12 = pnand %p1584_p11, %p1581_p10 }
 0xac4   :  { %1589 = shalt.err (!%p1586_p12)
}
 0xac5   :  { %s1675_s0 = smov 128   ;;  %s1676_s25 = smov 8  }
 0xac6   :  { %1208 = dma.vmem_to_hbm [thread:$0]  %s1203_s18, 1024, %s2386_s6, [#allocation8], %s1675_s0, %s1675_s0, %s1676_s25  }
 0xac7   :  { %s1677_s27 = smov [#allocation12]  }
 0xac8   :  { %s1214_s28 = sshll.u32 %s1677_s27, 4  ;;  %s1215_s28 = int_to_ptr.vmem [resolvable:$true] %s1214_s28 }
 0xac9   :  { %s1590_s29 = scalar_lea.vmem %s1215_s28, 1024  ;;  %p1595_p0 = scmp.lt.s32.totalorder %s1215_s28, %s1215_s28 }
 0xaca   :  { %p1591_p13 = scmp.ne.s32.totalorder %s1215_s28, %s1590_s29  ;;  %p1596_p1 = scmp.lt.s32.totalorder %s1590_s29, %s1590_s29 }
 0xacc   :  { %p1597_p2 = por %p1596_p1, %p1595_p0 }
 0xace   :  { %p1598_p3 = pnand %p1597_p2, %p1591_p13 }
 0xad0   :  { %1601 = shalt.err (!%p1598_p3)
}
 0xad1   :  { %s1602_s9 = scalar_lea.hbm %s2387_s7, 1024 }
 0xad2   :  { %p1603_p4 = scmp.ne.s32.totalorder %s2387_s7, %s1602_s9  ;;  %p1606_p5 = scmp.lt.u32.totalorder %s1602_s9, %s2387_s7 }
 0xad4   :  { %p1608_p6 = pnand %p1606_p5, %p1603_p4 }
 0xad6   :  { %1611 = shalt.err (!%p1608_p6)
}
 0xad7   :  { %1220 = dma.vmem_to_hbm [thread:$0]  %s1215_s28, 1024, %s2387_s7, [#allocation13], %s1675_s0, %s1675_s0, %s1676_s25  }
 0xad8   :  { %1636 = dma.done.wait [#allocation8], 1024  }
 0xad9   :  { %1637 = vsyncadd [#allocation8], 4294966272 }
 0xada   :  { %1638 = dma.done.wait [#allocation13], 1024  }
 0xadb   :  { %1639 = vsyncadd [#allocation13], 4294966272 }
 0xadc   :  { %1227 = vsyncpa [#allocation7], 1 }
 0xadd   :  { %1228 = vsyncpa [#allocation10], 1 }
 0xade   :  { %1229 = vsyncpa [#allocation8], 1 }
 0xadf   :  { %1230 = vsyncpa [#allocation13], 1 }

</bundles_post_ra>
